<compile_context>
chip_gen: v6e
topology: v6e:2x2x1
jax: 0.10.0
libtpu: 0.0.40
codegen_flags: <defaults>
</compile_context>

<pallas_src>
import numpy as np
import jax
import jax.numpy as jnp
from jax import lax
from jax.experimental import pallas as pl
from jax.experimental.pallas import tpu as pltpu


def _round_up(x, m):
    return ((x + m - 1) // m) * m


def _lstm_kernel(lens_ref, x_ref, wih_ref, whh_ref, b_ref,
                 out_ref, hn_ref,
                 c_scr, gx_scr):
    """One time-chunk of the LSTM recurrence.

    lens_ref: (Bp, 1)        i32   sequence lengths (padded batch rows have 0)
    x_ref   : (TB*Bp, I)     bf16  time-major chunk, row = t_local*Bp + b
    wih_ref : (I, 4Hp)       bf16  W_ih^T, per-gate padded to Hp
    whh_ref : (Hp, 4Hp)      bf16  W_hh^T, per-gate padded to Hp
    b_ref   : (1, 4Hp)       f32   b_ih + b_hh (padded)
    out_ref : (TB, Bp, Hp)   bf16  time-major output chunk
    hn_ref  : (Bp, Hp)       f32   final hidden state; doubles as the resident h state
    c_scr   : (Bp, Hp)       f32   cell state, persists across grid steps
    gx_scr  : (TB*Bp, 4Hp)   f32   chunk input projection
    """
    TB = out_ref.shape[0]
    Bp, Hp = hn_ref.shape

    t_chunk = pl.program_id(0)

    @pl.when(t_chunk == 0)
    def _():
        hn_ref[...] = jnp.zeros_like(hn_ref)
        c_scr[...] = jnp.zeros_like(c_scr)

    # Chunk-level input projection: one big bf16 MXU matmul for all TB timesteps,
    # hoisted off the serial recurrence; bias folded in here.
    gx_scr[...] = jnp.dot(x_ref[...], wih_ref[...],
                          preferred_element_type=jnp.float32) + b_ref[...]

    lens = lens_ref[...]          # (Bp, 1), loop-invariant load hoisted
    t0 = t_chunk * TB

    # h/c are carried as values (vregs) across the statically unrolled chunk; the scratch /
    # resident output refs are only touched once per chunk.
    h = hn_ref[...]
    c = c_scr[...]

    for tl in range(TB):
        # Only the small bf16 (Bp,Hp)x(Hp,4Hp) recurrent matmul stays on the critical path.
        gates = gx_scr[pl.ds(tl * Bp, Bp), :] + jnp.dot(
            h.astype(jnp.bfloat16), whh_ref[...],
            preferred_element_type=jnp.float32)

        # Hp is a multiple of 128, so gate slices are lane aligned.
        i_g = jax.nn.sigmoid(gates[:, 0 * Hp:1 * Hp])
        f_g = jax.nn.sigmoid(gates[:, 1 * Hp:2 * Hp])
        g_g = jnp.tanh(gates[:, 2 * Hp:3 * Hp])
        o_g = jax.nn.sigmoid(gates[:, 3 * Hp:4 * Hp])

        c_new = f_g * c + i_g * g_g
        h_new = o_g * jnp.tanh(c_new)

        # pack_padded_sequence semantics: freeze state / zero output past seq_len.
        mask = (t0 + tl) < lens                       # (Bp, 1), broadcasts over Hp
        h = jnp.where(mask, h_new, h)
        c = jnp.where(mask, c_new, c)
        out_ref[tl] = jnp.where(mask, h_new, 0.0).astype(out_ref.dtype)

    # Single writeback per chunk; hn_ref is resident (constant index map) so it carries the
    # state to the next chunk and is flushed to HBM once at grid end.
    hn_ref[...] = h
    c_scr[...] = c


def dynamic_lstm(x, seq_lens, w_ih, w_hh, b_ih, b_hh, *, time_block=32):
    """x: (B, T, I) f32, seq_lens: (B,) int (host-concrete). Returns (out, (ht, ct))."""
    B, T, I = x.shape
    H = w_hh.shape[1]

    Hp = _round_up(H, 128)     # lane-dense hidden dim
    Bp = _round_up(B, 8)       # sublane-dense batch

    # pad_packed_sequence truncates to the max actual length; also bounds the loop.
    # NOTE: requires host-concrete seq_lens (matches the module's numpy-list contract).
    max_len = int(np.max(np.asarray(seq_lens)))
    max_len = max(max_len, 1)

    # ---- per-generation VMEM budget; pick the largest TB that fits ----
    try:
        vmem_cap = int(pltpu.get_tpu_info().vmem_capacity_bytes)
    except Exception:
        vmem_cap = 64 * 1024 * 1024                    # conservative (v7x per-TC)
    vmem_budget = int(vmem_cap * 3 // 4)

    def vmem_bytes(tb):
        return (I * 4 * Hp * 2                         # W_ih^T bf16 (resident)
                + Hp * 4 * Hp * 2                      # W_hh^T bf16 (resident)
                + 4 * Hp * 4 + Bp * 4                  # bias, lens
                + 2 * Bp * Hp * 4                      # hn block + c scratch (f32)
                + tb * Bp * 4 * Hp * 4                 # gx scratch (f32)
                + 2 * tb * Bp * I * 2                  # double-buffered x blocks (bf16)
                + 2 * tb * Bp * Hp * 2)                # double-buffered out blocks (bf16)

    TB = max(8, min(time_block, _round_up(max_len, 8)))
    while TB > 8 and vmem_bytes(TB) > vmem_budget:
        TB //= 2

    Tp = _round_up(max_len, TB)
    num_chunks = Tp // TB
    vmem_limit = int(min(vmem_budget, max(32 * 1024 * 1024, 2 * vmem_bytes(TB))))

    # ---- weights: pad each gate block H -> Hp so gate slices stay lane aligned ----
    def pad_gates(w):          # (4H, K) -> (4Hp, K)
        K = w.shape[1]
        w4 = w.reshape(4, H, K)
        return jnp.pad(w4, ((0, 0), (0, Hp - H), (0, 0))).reshape(4 * Hp, K)

    wih_t = jnp.transpose(pad_gates(w_ih)).astype(jnp.bfloat16)            # (I, 4Hp) bf16
    whh_p = jnp.pad(pad_gates(w_hh), ((0, 0), (0, Hp - H)))                # (4Hp, Hp)
    whh_t = jnp.transpose(whh_p).astype(jnp.bfloat16)                      # (Hp, 4Hp) bf16
    bias = jnp.pad((b_ih + b_hh).reshape(4, H), ((0, 0), (0, Hp - H)))
    bias = bias.reshape(1, 4 * Hp).astype(jnp.float32)

    # ---- inputs: pad batch -> Bp, time -> Tp; flatten time-major so the kernel needs
    #      no in-kernel transposes/reshapes of the bf16 block (row = t*Bp + b) ----
    Tc = min(T, Tp)
    x_bf = x[:, :Tc].astype(jnp.bfloat16)                                  # cast folded w/ copy
    x_bf = jnp.pad(x_bf, ((0, Bp - B), (0, Tp - Tc), (0, 0)))              # (Bp, Tp, I)
    x2d = jnp.transpose(x_bf, (1, 0, 2)).reshape(Tp * Bp, I)               # (Tp*Bp, I)

    lens = jnp.asarray(seq_lens, jnp.int32)
    lens2d = jnp.pad(lens, (0, Bp - B)).reshape(Bp, 1)                     # padded rows: len 0

    # Advisory cost so XLA schedules neighbours around this long, serial kernel.
    cost = pl.CostEstimate(
        flops=int(2 * Tp * Bp * I * 4 * Hp + 2 * Tp * Bp * Hp * 4 * Hp + 12 * Tp * Bp * Hp),
        transcendentals=int(5 * Tp * Bp * Hp),
        bytes_accessed=int(Tp * Bp * I * 2 + Tp * Bp * Hp * 2 + Bp * Hp * 4
                           + I * 4 * Hp * 2 + Hp * 4 * Hp * 2 + 4 * Hp * 4),
    )

    out_tm, h_n = pl.pallas_call(
        _lstm_kernel,
        grid=(num_chunks,),
        in_specs=[
            pl.BlockSpec((Bp, 1), lambda t: (0, 0)),            # lens (resident)
            pl.BlockSpec((TB * Bp, I), lambda t: (t, 0)),       # x chunk (pipelined DMA)
            pl.BlockSpec((I, 4 * Hp), lambda t: (0, 0)),        # W_ih^T (resident)
            pl.BlockSpec((Hp, 4 * Hp), lambda t: (0, 0)),       # W_hh^T (resident)
            pl.BlockSpec((1, 4 * Hp), lambda t: (0, 0)),        # bias (resident)
        ],
        out_specs=(
            pl.BlockSpec((TB, Bp, Hp), lambda t: (t, 0, 0)),    # out chunk (pipelined DMA)
            pl.BlockSpec((Bp, Hp), lambda t: (0, 0)),           # h_n (resident; also h state)
        ),
        out_shape=(
            jax.ShapeDtypeStruct((Tp, Bp, Hp), jnp.bfloat16),
            jax.ShapeDtypeStruct((Bp, Hp), jnp.float32),
        ),
        scratch_shapes=[
            pltpu.VMEM((Bp, Hp), jnp.float32),                  # c state
            pltpu.VMEM((TB * Bp, 4 * Hp), jnp.float32),         # chunk input projection
        ],
        compiler_params=pltpu.CompilerParams(
            dimension_semantics=("arbitrary",),                 # time is a serial recurrence
            vmem_limit_bytes=vmem_limit,
        ),
        cost_estimate=cost,
    )(lens2d, x2d, wih_t, whh_t, bias)

    # (Tp, Bp, Hp) time-major bf16 -> (B, max_len, H) batch-first f32.
    out = jnp.transpose(out_tm, (1, 0, 2))[:B, :max_len, :H].astype(jnp.float32)

    # Reproduce the module exactly: ht = h_n transposed to (B, 1, H);
    # ct is ALSO h_n (module bug: `ct = ht.detach()`), shape (1, B, H).
    hn = h_n[:B, :H]
    ht = hn[:, None, :]
    ct = hn[None, :, :]
    return out, (ht, ct)


def _reference_lstm(x, seq_lens, w_ih, w_hh, b_ih, b_hh):
    """Pure-JAX f32 reference (lax.scan) for validation."""
    B, T, I = x.shape
    H = w_hh.shape[1]
    lens = jnp.asarray(seq_lens, jnp.int32)

    def step(carry, inp):
        h, c = carry
        x_t, t = inp
        gates = x_t @ w_ih.T + h @ w_hh.T + b_ih + b_hh
        i_g = jax.nn.sigmoid(gates[:, 0 * H:1 * H])
        f_g = jax.nn.sigmoid(gates[:, 1 * H:2 * H])
        g_g = jnp.tanh(gates[:, 2 * H:3 * H])
        o_g = jax.nn.sigmoid(gates[:, 3 * H:4 * H])
        c_new = f_g * c + i_g * g_g
        h_new = o_g * jnp.tanh(c_new)
        mask = (t < lens)[:, None]
        h2 = jnp.where(mask, h_new, h)
        c2 = jnp.where(mask, c_new, c)
        return (h2, c2), jnp.where(mask, h_new, 0.0)

    init = (jnp.zeros((B, H), jnp.float32), jnp.zeros((B, H), jnp.float32))
    (h_n, _), outs = lax.scan(step, init, (jnp.transpose(x, (1, 0, 2)), jnp.arange(T)))
    return jnp.transpose(outs, (1, 0, 2)), h_n


if __name__ == "__main__":
    B, T, I, H = 2, 8, 16, 32

    key = jax.random.PRNGKey(0)
    kx, k1, k2, k3, k4 = jax.random.split(key, 5)

    x = jax.random.normal(kx, (B, T, I), dtype=jnp.float32)
    seq_lens = jnp.array([8, 5], dtype=jnp.int32)

    # nn.LSTM default init: U(-1/sqrt(H), 1/sqrt(H)); gate order i, f, g, o.
    k = 1.0 / np.sqrt(H)
    w_ih = jax.random.uniform(k1, (4 * H, I), jnp.float32, -k, k)
    w_hh = jax.random.uniform(k2, (4 * H, H), jnp.float32, -k, k)
    b_ih = jax.random.uniform(k3, (4 * H,), jnp.float32, -k, k)
    b_hh = jax.random.uniform(k4, (4 * H,), jnp.float32, -k, k)

    out, (ht, ct) = dynamic_lstm(x, seq_lens, w_ih, w_hh, b_ih, b_hh)
    jax.block_until_ready((out, ht, ct))

    # Validate against a pure-JAX f32 reference (kernel uses bf16 matmuls / bf16 out stream).
    ref_out, ref_hn = _reference_lstm(x, seq_lens, w_ih, w_hh, b_ih, b_hh)
    max_len = int(np.max(np.asarray(seq_lens)))
    np.testing.assert_allclose(np.asarray(out), np.asarray(ref_out[:, :max_len]),
                               rtol=2e-2, atol=2e-2)
    np.testing.assert_allclose(np.asarray(ht[:, 0, :]), np.asarray(ref_hn),
                               rtol=2e-2, atol=2e-2)
    np.testing.assert_allclose(np.asarray(ct[0]), np.asarray(ref_hn),
                               rtol=2e-2, atol=2e-2)

    assert out.shape == (B, max_len, H)
    assert ht.shape == (B, 1, H)
    assert ct.shape == (1, B, H)

    print("KERNEL_OK")
</pallas_src>

<mosaic_0001>
module attributes {stable_mosaic.version = 11 : i64} {
  func.func @_lstm_kernel(%arg0: i32, %arg1: memref<8x1xi32, #tpu.memory_space<vmem>>, %arg2: memref<64x16xbf16, #tpu.memory_space<vmem>>, %arg3: memref<16x512xbf16, #tpu.memory_space<vmem>>, %arg4: memref<128x512xbf16, #tpu.memory_space<vmem>>, %arg5: memref<1x512xf32, #tpu.memory_space<vmem>>, %arg6: memref<8x8x128xbf16, #tpu.memory_space<vmem>>, %arg7: memref<8x128xf32, #tpu.memory_space<vmem>>, %arg8: memref<8x128xf32, #tpu.memory_space<vmem>>, %arg9: memref<64x512xf32, #tpu.memory_space<vmem>>) attributes {dimension_semantics = [#tpu.dimension_semantics<arbitrary>], iteration_bounds = array<i64: 1>, scalar_prefetch = 0 : i64, scratch_operands = 2 : i64, tpu.core_type = #tpu.core_type<tc>, window_params = [{pipeline_mode = #tpu.pipeline_mode<synchronous>, transform_indices = @transform_0, window_bounds = array<i64: 8, 1>}, {transform_indices = @transform_1, window_bounds = array<i64: 64, 16>}, {pipeline_mode = #tpu.pipeline_mode<synchronous>, transform_indices = @transform_2, window_bounds = array<i64: 16, 512>}, {pipeline_mode = #tpu.pipeline_mode<synchronous>, transform_indices = @transform_3, window_bounds = array<i64: 128, 512>}, {pipeline_mode = #tpu.pipeline_mode<synchronous>, transform_indices = @transform_4, window_bounds = array<i64: 1, 512>}, {transform_indices = @transform_5, window_bounds = array<i64: 8, 8, 128>}, {pipeline_mode = #tpu.pipeline_mode<synchronous>, transform_indices = @transform_6, window_bounds = array<i64: 8, 128>}]} {
    %c0_i32 = arith.constant 0 : i32
    %0 = arith.cmpi eq, %arg0, %c0_i32 : i32
    %1 = arith.extui %0 : i1 to i32
    %c0_i32_0 = arith.constant 0 : i32
    %2 = arith.cmpi ne, %1, %c0_i32_0 : i32
    scf.if %2 {
      %cst_101 = arith.constant 0.000000e+00 : f32
      %392 = vector.broadcast %cst_101 : f32 to vector<8x128xf32>
      %c0_102 = arith.constant 0 : index
      %c0_103 = arith.constant 0 : index
      %393 = vector.load %arg7[%c0_102, %c0_103] : memref<8x128xf32, #tpu.memory_space<vmem>>, vector<8x128xf32>
      tpu.vector_store %arg7[%c0_102, %c0_103], %392 {strides = array<i32>} : memref<8x128xf32, #tpu.memory_space<vmem>>, vector<8x128xf32>,
      %cst_104 = arith.constant 0.000000e+00 : f32
      %394 = vector.broadcast %cst_104 : f32 to vector<8x128xf32>
      %c0_105 = arith.constant 0 : index
      %c0_106 = arith.constant 0 : index
      %395 = vector.load %arg8[%c0_105, %c0_106] : memref<8x128xf32, #tpu.memory_space<vmem>>, vector<8x128xf32>
      tpu.vector_store %arg8[%c0_105, %c0_106], %394 {strides = array<i32>} : memref<8x128xf32, #tpu.memory_space<vmem>>, vector<8x128xf32>,
    } else {
    }
    %c0 = arith.constant 0 : index
    %c0_1 = arith.constant 0 : index
    %3 = vector.load %arg2[%c0, %c0_1] : memref<64x16xbf16, #tpu.memory_space<vmem>>, vector<64x16xbf16>
    %c0_2 = arith.constant 0 : index
    %c0_3 = arith.constant 0 : index
    %4 = vector.load %arg3[%c0_2, %c0_3] : memref<16x512xbf16, #tpu.memory_space<vmem>>, vector<16x512xbf16>
    %cst = arith.constant dense<0.000000e+00> : vector<64x512xf32>
    %5 = tpu.matmul %3, %4, %cst {dimension_numbers = #tpu.dot_dimension_numbers<[1], [0], [0], [1], [0, 0, 1, 1], [], []>} : vector<64x16xbf16>, vector<16x512xbf16>, vector<64x512xf32> -> vector<64x512xf32>
    %c0_4 = arith.constant 0 : index
    %c0_5 = arith.constant 0 : index
    %6 = vector.load %arg5[%c0_4, %c0_5] : memref<1x512xf32, #tpu.memory_space<vmem>>, vector<1x512xf32>
    %7 = vector.broadcast %6 : vector<1x512xf32> to vector<64x512xf32>
    %8 = arith.addf %5, %7 : vector<64x512xf32>
    %c0_6 = arith.constant 0 : index
    %c0_7 = arith.constant 0 : index
    %9 = vector.load %arg9[%c0_6, %c0_7] : memref<64x512xf32, #tpu.memory_space<vmem>>, vector<64x512xf32>
    tpu.vector_store %arg9[%c0_6, %c0_7], %8 {strides = array<i32>} : memref<64x512xf32, #tpu.memory_space<vmem>>, vector<64x512xf32>,
    %c0_8 = arith.constant 0 : index
    %c0_9 = arith.constant 0 : index
    %10 = vector.load %arg1[%c0_8, %c0_9] : memref<8x1xi32, #tpu.memory_space<vmem>>, vector<8x1xi32>
    %c8_i32 = arith.constant 8 : i32
    %11 = arith.muli %arg0, %c8_i32 : i32
    %c0_10 = arith.constant 0 : index
    %c0_11 = arith.constant 0 : index
    %12 = vector.load %arg7[%c0_10, %c0_11] : memref<8x128xf32, #tpu.memory_space<vmem>>, vector<8x128xf32>
    %c0_12 = arith.constant 0 : index
    %c0_13 = arith.constant 0 : index
    %13 = vector.load %arg8[%c0_12, %c0_13] : memref<8x128xf32, #tpu.memory_space<vmem>>, vector<8x128xf32>
    %c0_14 = arith.constant 0 : index
    %c0_15 = arith.constant 0 : index
    %14 = vector.load %arg9[%c0_14, %c0_15] : memref<64x512xf32, #tpu.memory_space<vmem>>, vector<8x512xf32>
    %15 = arith.truncf %12 : vector<8x128xf32> to vector<8x128xbf16>
    %c0_16 = arith.constant 0 : index
    %c0_17 = arith.constant 0 : index
    %16 = vector.load %arg4[%c0_16, %c0_17] : memref<128x512xbf16, #tpu.memory_space<vmem>>, vector<128x512xbf16>
    %cst_18 = arith.constant dense<0.000000e+00> : vector<8x512xf32>
    %17 = tpu.matmul %15, %16, %cst_18 {dimension_numbers = #tpu.dot_dimension_numbers<[1], [0], [0], [1], [0, 0, 1, 1], [], []>} : vector<8x128xbf16>, vector<128x512xbf16>, vector<8x512xf32> -> vector<8x512xf32>
    %18 = arith.addf %14, %17 : vector<8x512xf32>
    %19 = vector.extract_strided_slice %18 {offsets = [0, 0], sizes = [8, 128], strides = [1, 1]} : vector<8x512xf32> to vector<8x128xf32>
    %20 = arith.negf %19 : vector<8x128xf32>
    %21 = math.exp %20 : vector<8x128xf32>
    %cst_19 = arith.constant 1.000000e+00 : f32
    %22 = vector.broadcast %cst_19 : f32 to vector<8x128xf32>
    %23 = arith.addf %22, %21 : vector<8x128xf32>
    %24 = arith.divf %22, %23 : vector<8x128xf32>
    %25 = vector.extract_strided_slice %18 {offsets = [0, 128], sizes = [8, 128], strides = [1, 1]} : vector<8x512xf32> to vector<8x128xf32>
    %26 = arith.negf %25 : vector<8x128xf32>
    %27 = math.exp %26 : vector<8x128xf32>
    %cst_20 = arith.constant 1.000000e+00 : f32
    %28 = vector.broadcast %cst_20 : f32 to vector<8x128xf32>
    %29 = arith.addf %28, %27 : vector<8x128xf32>
    %30 = arith.divf %28, %29 : vector<8x128xf32>
    %31 = vector.extract_strided_slice %18 {offsets = [0, 256], sizes = [8, 128], strides = [1, 1]} : vector<8x512xf32> to vector<8x128xf32>
    %32 = math.tanh %31 : vector<8x128xf32>
    %33 = vector.extract_strided_slice %18 {offsets = [0, 384], sizes = [8, 128], strides = [1, 1]} : vector<8x512xf32> to vector<8x128xf32>
    %34 = arith.negf %33 : vector<8x128xf32>
    %35 = math.exp %34 : vector<8x128xf32>
    %cst_21 = arith.constant 1.000000e+00 : f32
    %36 = vector.broadcast %cst_21 : f32 to vector<8x128xf32>
    %37 = arith.addf %36, %35 : vector<8x128xf32>
    %38 = arith.divf %36, %37 : vector<8x128xf32>
    %39 = arith.mulf %30, %13 : vector<8x128xf32>
    %40 = arith.mulf %24, %32 : vector<8x128xf32>
    %41 = arith.addf %39, %40 : vector<8x128xf32>
    %42 = math.tanh %41 : vector<8x128xf32>
    %43 = arith.mulf %38, %42 : vector<8x128xf32>
    %c0_i32_22 = arith.constant 0 : i32
    %44 = arith.addi %11, %c0_i32_22 : i32
    %45 = vector.broadcast %44 : i32 to vector<8x1xi32>
    %46 = arith.cmpi slt, %45, %10 : vector<8x1xi32>
    %47 = vector.shape_cast %46 : vector<8x1xi1> to vector<8x1xi1>
    %48 = vector.broadcast %47 : vector<8x1xi1> to vector<8x128xi1>
    %49 = arith.select %48, %43, %12 : vector<8x128xi1>, vector<8x128xf32>
    %50 = vector.shape_cast %46 : vector<8x1xi1> to vector<8x1xi1>
    %51 = vector.broadcast %50 : vector<8x1xi1> to vector<8x128xi1>
    %52 = arith.select %51, %41, %13 : vector<8x128xi1>, vector<8x128xf32>
    %cst_23 = arith.constant 0.000000e+00 : f32
    %53 = vector.shape_cast %46 : vector<8x1xi1> to vector<8x1xi1>
    %54 = vector.broadcast %53 : vector<8x1xi1> to vector<8x128xi1>
    %55 = vector.broadcast %cst_23 : f32 to vector<8x128xf32>
    %56 = arith.select %54, %43, %55 : vector<8x128xi1>, vector<8x128xf32>
    %57 = arith.truncf %56 : vector<8x128xf32> to vector<8x128xbf16>
    %c0_24 = arith.constant 0 : index
    %c0_25 = arith.constant 0 : index
    %c0_26 = arith.constant 0 : index
    %58 = vector.load %arg6[%c0_24, %c0_25, %c0_26] : memref<8x8x128xbf16, #tpu.memory_space<vmem>>, vector<1x8x128xbf16>
    %59 = vector.shape_cast %58 : vector<1x8x128xbf16> to vector<8x128xbf16>
    %60 = vector.shape_cast %57 : vector<8x128xbf16> to vector<1x8x128xbf16>
    tpu.vector_store %arg6[%c0_24, %c0_25, %c0_26], %60 {strides = array<i32>} : memref<8x8x128xbf16, #tpu.memory_space<vmem>>, vector<1x8x128xbf16>,
    %c8 = arith.constant 8 : index
    %c0_27 = arith.constant 0 : index
    %61 = vector.load %arg9[%c8, %c0_27] : memref<64x512xf32, #tpu.memory_space<vmem>>, vector<8x512xf32>
    %62 = arith.truncf %49 : vector<8x128xf32> to vector<8x128xbf16>
    %c0_28 = arith.constant 0 : index
    %c0_29 = arith.constant 0 : index
    %63 = vector.load %arg4[%c0_28, %c0_29] : memref<128x512xbf16, #tpu.memory_space<vmem>>, vector<128x512xbf16>
    %cst_30 = arith.constant dense<0.000000e+00> : vector<8x512xf32>
    %64 = tpu.matmul %62, %63, %cst_30 {dimension_numbers = #tpu.dot_dimension_numbers<[1], [0], [0], [1], [0, 0, 1, 1], [], []>} : vector<8x128xbf16>, vector<128x512xbf16>, vector<8x512xf32> -> vector<8x512xf32>
    %65 = arith.addf %61, %64 : vector<8x512xf32>
    %66 = vector.extract_strided_slice %65 {offsets = [0, 0], sizes = [8, 128], strides = [1, 1]} : vector<8x512xf32> to vector<8x128xf32>
    %67 = arith.negf %66 : vector<8x128xf32>
    %68 = math.exp %67 : vector<8x128xf32>
    %cst_31 = arith.constant 1.000000e+00 : f32
    %69 = vector.broadcast %cst_31 : f32 to vector<8x128xf32>
    %70 = arith.addf %69, %68 : vector<8x128xf32>
    %71 = arith.divf %69, %70 : vector<8x128xf32>
    %72 = vector.extract_strided_slice %65 {offsets = [0, 128], sizes = [8, 128], strides = [1, 1]} : vector<8x512xf32> to vector<8x128xf32>
    %73 = arith.negf %72 : vector<8x128xf32>
    %74 = math.exp %73 : vector<8x128xf32>
    %cst_32 = arith.constant 1.000000e+00 : f32
    %75 = vector.broadcast %cst_32 : f32 to vector<8x128xf32>
    %76 = arith.addf %75, %74 : vector<8x128xf32>
    %77 = arith.divf %75, %76 : vector<8x128xf32>
    %78 = vector.extract_strided_slice %65 {offsets = [0, 256], sizes = [8, 128], strides = [1, 1]} : vector<8x512xf32> to vector<8x128xf32>
    %79 = math.tanh %78 : vector<8x128xf32>
    %80 = vector.extract_strided_slice %65 {offsets = [0, 384], sizes = [8, 128], strides = [1, 1]} : vector<8x512xf32> to vector<8x128xf32>
    %81 = arith.negf %80 : vector<8x128xf32>
    %82 = math.exp %81 : vector<8x128xf32>
    %cst_33 = arith.constant 1.000000e+00 : f32
    %83 = vector.broadcast %cst_33 : f32 to vector<8x128xf32>
    %84 = arith.addf %83, %82 : vector<8x128xf32>
    %85 = arith.divf %83, %84 : vector<8x128xf32>
    %86 = arith.mulf %77, %52 : vector<8x128xf32>
    %87 = arith.mulf %71, %79 : vector<8x128xf32>
    %88 = arith.addf %86, %87 : vector<8x128xf32>
    %89 = math.tanh %88 : vector<8x128xf32>
    %90 = arith.mulf %85, %89 : vector<8x128xf32>
    %c1_i32 = arith.constant 1 : i32
    %91 = arith.addi %11, %c1_i32 : i32
    %92 = vector.broadcast %91 : i32 to vector<8x1xi32>
    %93 = arith.cmpi slt, %92, %10 : vector<8x1xi32>
    %94 = vector.shape_cast %93 : vector<8x1xi1> to vector<8x1xi1>
    %95 = vector.broadcast %94 : vector<8x1xi1> to vector<8x128xi1>
    %96 = arith.select %95, %90, %49 : vector<8x128xi1>, vector<8x128xf32>
    %97 = vector.shape_cast %93 : vector<8x1xi1> to vector<8x1xi1>
    %98 = vector.broadcast %97 : vector<8x1xi1> to vector<8x128xi1>
    %99 = arith.select %98, %88, %52 : vector<8x128xi1>, vector<8x128xf32>
    %cst_34 = arith.constant 0.000000e+00 : f32
    %100 = vector.shape_cast %93 : vector<8x1xi1> to vector<8x1xi1>
    %101 = vector.broadcast %100 : vector<8x1xi1> to vector<8x128xi1>
    %102 = vector.broadcast %cst_34 : f32 to vector<8x128xf32>
    %103 = arith.select %101, %90, %102 : vector<8x128xi1>, vector<8x128xf32>
    %104 = arith.truncf %103 : vector<8x128xf32> to vector<8x128xbf16>
    %c1 = arith.constant 1 : index
    %c0_35 = arith.constant 0 : index
    %c0_36 = arith.constant 0 : index
    %105 = vector.load %arg6[%c1, %c0_35, %c0_36] : memref<8x8x128xbf16, #tpu.memory_space<vmem>>, vector<1x8x128xbf16>
    %106 = vector.shape_cast %105 : vector<1x8x128xbf16> to vector<8x128xbf16>
    %107 = vector.shape_cast %104 : vector<8x128xbf16> to vector<1x8x128xbf16>
    tpu.vector_store %arg6[%c1, %c0_35, %c0_36], %107 {strides = array<i32>} : memref<8x8x128xbf16, #tpu.memory_space<vmem>>, vector<1x8x128xbf16>,
    %c16 = arith.constant 16 : index
    %c0_37 = arith.constant 0 : index
    %108 = vector.load %arg9[%c16, %c0_37] : memref<64x512xf32, #tpu.memory_space<vmem>>, vector<8x512xf32>
    %109 = arith.truncf %96 : vector<8x128xf32> to vector<8x128xbf16>
    %c0_38 = arith.constant 0 : index
    %c0_39 = arith.constant 0 : index
    %110 = vector.load %arg4[%c0_38, %c0_39] : memref<128x512xbf16, #tpu.memory_space<vmem>>, vector<128x512xbf16>
    %cst_40 = arith.constant dense<0.000000e+00> : vector<8x512xf32>
    %111 = tpu.matmul %109, %110, %cst_40 {dimension_numbers = #tpu.dot_dimension_numbers<[1], [0], [0], [1], [0, 0, 1, 1], [], []>} : vector<8x128xbf16>, vector<128x512xbf16>, vector<8x512xf32> -> vector<8x512xf32>
    %112 = arith.addf %108, %111 : vector<8x512xf32>
    %113 = vector.extract_strided_slice %112 {offsets = [0, 0], sizes = [8, 128], strides = [1, 1]} : vector<8x512xf32> to vector<8x128xf32>
    %114 = arith.negf %113 : vector<8x128xf32>
    %115 = math.exp %114 : vector<8x128xf32>
    %cst_41 = arith.constant 1.000000e+00 : f32
    %116 = vector.broadcast %cst_41 : f32 to vector<8x128xf32>
    %117 = arith.addf %116, %115 : vector<8x128xf32>
    %118 = arith.divf %116, %117 : vector<8x128xf32>
    %119 = vector.extract_strided_slice %112 {offsets = [0, 128], sizes = [8, 128], strides = [1, 1]} : vector<8x512xf32> to vector<8x128xf32>
    %120 = arith.negf %119 : vector<8x128xf32>
    %121 = math.exp %120 : vector<8x128xf32>
    %cst_42 = arith.constant 1.000000e+00 : f32
    %122 = vector.broadcast %cst_42 : f32 to vector<8x128xf32>
    %123 = arith.addf %122, %121 : vector<8x128xf32>
    %124 = arith.divf %122, %123 : vector<8x128xf32>
    %125 = vector.extract_strided_slice %112 {offsets = [0, 256], sizes = [8, 128], strides = [1, 1]} : vector<8x512xf32> to vector<8x128xf32>
    %126 = math.tanh %125 : vector<8x128xf32>
    %127 = vector.extract_strided_slice %112 {offsets = [0, 384], sizes = [8, 128], strides = [1, 1]} : vector<8x512xf32> to vector<8x128xf32>
    %128 = arith.negf %127 : vector<8x128xf32>
    %129 = math.exp %128 : vector<8x128xf32>
    %cst_43 = arith.constant 1.000000e+00 : f32
    %130 = vector.broadcast %cst_43 : f32 to vector<8x128xf32>
    %131 = arith.addf %130, %129 : vector<8x128xf32>
    %132 = arith.divf %130, %131 : vector<8x128xf32>
    %133 = arith.mulf %124, %99 : vector<8x128xf32>
    %134 = arith.mulf %118, %126 : vector<8x128xf32>
    %135 = arith.addf %133, %134 : vector<8x128xf32>
    %136 = math.tanh %135 : vector<8x128xf32>
    %137 = arith.mulf %132, %136 : vector<8x128xf32>
    %c2_i32 = arith.constant 2 : i32
    %138 = arith.addi %11, %c2_i32 : i32
    %139 = vector.broadcast %138 : i32 to vector<8x1xi32>
    %140 = arith.cmpi slt, %139, %10 : vector<8x1xi32>
    %141 = vector.shape_cast %140 : vector<8x1xi1> to vector<8x1xi1>
    %142 = vector.broadcast %141 : vector<8x1xi1> to vector<8x128xi1>
    %143 = arith.select %142, %137, %96 : vector<8x128xi1>, vector<8x128xf32>
    %144 = vector.shape_cast %140 : vector<8x1xi1> to vector<8x1xi1>
    %145 = vector.broadcast %144 : vector<8x1xi1> to vector<8x128xi1>
    %146 = arith.select %145, %135, %99 : vector<8x128xi1>, vector<8x128xf32>
    %cst_44 = arith.constant 0.000000e+00 : f32
    %147 = vector.shape_cast %140 : vector<8x1xi1> to vector<8x1xi1>
    %148 = vector.broadcast %147 : vector<8x1xi1> to vector<8x128xi1>
    %149 = vector.broadcast %cst_44 : f32 to vector<8x128xf32>
    %150 = arith.select %148, %137, %149 : vector<8x128xi1>, vector<8x128xf32>
    %151 = arith.truncf %150 : vector<8x128xf32> to vector<8x128xbf16>
    %c2 = arith.constant 2 : index
    %c0_45 = arith.constant 0 : index
    %c0_46 = arith.constant 0 : index
    %152 = vector.load %arg6[%c2, %c0_45, %c0_46] : memref<8x8x128xbf16, #tpu.memory_space<vmem>>, vector<1x8x128xbf16>
    %153 = vector.shape_cast %152 : vector<1x8x128xbf16> to vector<8x128xbf16>
    %154 = vector.shape_cast %151 : vector<8x128xbf16> to vector<1x8x128xbf16>
    tpu.vector_store %arg6[%c2, %c0_45, %c0_46], %154 {strides = array<i32>} : memref<8x8x128xbf16, #tpu.memory_space<vmem>>, vector<1x8x128xbf16>,
    %c24 = arith.constant 24 : index
    %c0_47 = arith.constant 0 : index
    %155 = vector.load %arg9[%c24, %c0_47] : memref<64x512xf32, #tpu.memory_space<vmem>>, vector<8x512xf32>
    %156 = arith.truncf %143 : vector<8x128xf32> to vector<8x128xbf16>
    %c0_48 = arith.constant 0 : index
    %c0_49 = arith.constant 0 : index
    %157 = vector.load %arg4[%c0_48, %c0_49] : memref<128x512xbf16, #tpu.memory_space<vmem>>, vector<128x512xbf16>
    %cst_50 = arith.constant dense<0.000000e+00> : vector<8x512xf32>
    %158 = tpu.matmul %156, %157, %cst_50 {dimension_numbers = #tpu.dot_dimension_numbers<[1], [0], [0], [1], [0, 0, 1, 1], [], []>} : vector<8x128xbf16>, vector<128x512xbf16>, vector<8x512xf32> -> vector<8x512xf32>
    %159 = arith.addf %155, %158 : vector<8x512xf32>
    %160 = vector.extract_strided_slice %159 {offsets = [0, 0], sizes = [8, 128], strides = [1, 1]} : vector<8x512xf32> to vector<8x128xf32>
    %161 = arith.negf %160 : vector<8x128xf32>
    %162 = math.exp %161 : vector<8x128xf32>
    %cst_51 = arith.constant 1.000000e+00 : f32
    %163 = vector.broadcast %cst_51 : f32 to vector<8x128xf32>
    %164 = arith.addf %163, %162 : vector<8x128xf32>
    %165 = arith.divf %163, %164 : vector<8x128xf32>
    %166 = vector.extract_strided_slice %159 {offsets = [0, 128], sizes = [8, 128], strides = [1, 1]} : vector<8x512xf32> to vector<8x128xf32>
    %167 = arith.negf %166 : vector<8x128xf32>
    %168 = math.exp %167 : vector<8x128xf32>
    %cst_52 = arith.constant 1.000000e+00 : f32
    %169 = vector.broadcast %cst_52 : f32 to vector<8x128xf32>
    %170 = arith.addf %169, %168 : vector<8x128xf32>
    %171 = arith.divf %169, %170 : vector<8x128xf32>
    %172 = vector.extract_strided_slice %159 {offsets = [0, 256], sizes = [8, 128], strides = [1, 1]} : vector<8x512xf32> to vector<8x128xf32>
    %173 = math.tanh %172 : vector<8x128xf32>
    %174 = vector.extract_strided_slice %159 {offsets = [0, 384], sizes = [8, 128], strides = [1, 1]} : vector<8x512xf32> to vector<8x128xf32>
    %175 = arith.negf %174 : vector<8x128xf32>
    %176 = math.exp %175 : vector<8x128xf32>
    %cst_53 = arith.constant 1.000000e+00 : f32
    %177 = vector.broadcast %cst_53 : f32 to vector<8x128xf32>
    %178 = arith.addf %177, %176 : vector<8x128xf32>
    %179 = arith.divf %177, %178 : vector<8x128xf32>
    %180 = arith.mulf %171, %146 : vector<8x128xf32>
    %181 = arith.mulf %165, %173 : vector<8x128xf32>
    %182 = arith.addf %180, %181 : vector<8x128xf32>
    %183 = math.tanh %182 : vector<8x128xf32>
    %184 = arith.mulf %179, %183 : vector<8x128xf32>
    %c3_i32 = arith.constant 3 : i32
    %185 = arith.addi %11, %c3_i32 : i32
    %186 = vector.broadcast %185 : i32 to vector<8x1xi32>
    %187 = arith.cmpi slt, %186, %10 : vector<8x1xi32>
    %188 = vector.shape_cast %187 : vector<8x1xi1> to vector<8x1xi1>
    %189 = vector.broadcast %188 : vector<8x1xi1> to vector<8x128xi1>
    %190 = arith.select %189, %184, %143 : vector<8x128xi1>, vector<8x128xf32>
    %191 = vector.shape_cast %187 : vector<8x1xi1> to vector<8x1xi1>
    %192 = vector.broadcast %191 : vector<8x1xi1> to vector<8x128xi1>
    %193 = arith.select %192, %182, %146 : vector<8x128xi1>, vector<8x128xf32>
    %cst_54 = arith.constant 0.000000e+00 : f32
    %194 = vector.shape_cast %187 : vector<8x1xi1> to vector<8x1xi1>
    %195 = vector.broadcast %194 : vector<8x1xi1> to vector<8x128xi1>
    %196 = vector.broadcast %cst_54 : f32 to vector<8x128xf32>
    %197 = arith.select %195, %184, %196 : vector<8x128xi1>, vector<8x128xf32>
    %198 = arith.truncf %197 : vector<8x128xf32> to vector<8x128xbf16>
    %c3 = arith.constant 3 : index
    %c0_55 = arith.constant 0 : index
    %c0_56 = arith.constant 0 : index
    %199 = vector.load %arg6[%c3, %c0_55, %c0_56] : memref<8x8x128xbf16, #tpu.memory_space<vmem>>, vector<1x8x128xbf16>
    %200 = vector.shape_cast %199 : vector<1x8x128xbf16> to vector<8x128xbf16>
    %201 = vector.shape_cast %198 : vector<8x128xbf16> to vector<1x8x128xbf16>
    tpu.vector_store %arg6[%c3, %c0_55, %c0_56], %201 {strides = array<i32>} : memref<8x8x128xbf16, #tpu.memory_space<vmem>>, vector<1x8x128xbf16>,
    %c32 = arith.constant 32 : index
    %c0_57 = arith.constant 0 : index
    %202 = vector.load %arg9[%c32, %c0_57] : memref<64x512xf32, #tpu.memory_space<vmem>>, vector<8x512xf32>
    %203 = arith.truncf %190 : vector<8x128xf32> to vector<8x128xbf16>
    %c0_58 = arith.constant 0 : index
    %c0_59 = arith.constant 0 : index
    %204 = vector.load %arg4[%c0_58, %c0_59] : memref<128x512xbf16, #tpu.memory_space<vmem>>, vector<128x512xbf16>
    %cst_60 = arith.constant dense<0.000000e+00> : vector<8x512xf32>
    %205 = tpu.matmul %203, %204, %cst_60 {dimension_numbers = #tpu.dot_dimension_numbers<[1], [0], [0], [1], [0, 0, 1, 1], [], []>} : vector<8x128xbf16>, vector<128x512xbf16>, vector<8x512xf32> -> vector<8x512xf32>
    %206 = arith.addf %202, %205 : vector<8x512xf32>
    %207 = vector.extract_strided_slice %206 {offsets = [0, 0], sizes = [8, 128], strides = [1, 1]} : vector<8x512xf32> to vector<8x128xf32>
    %208 = arith.negf %207 : vector<8x128xf32>
    %209 = math.exp %208 : vector<8x128xf32>
    %cst_61 = arith.constant 1.000000e+00 : f32
    %210 = vector.broadcast %cst_61 : f32 to vector<8x128xf32>
    %211 = arith.addf %210, %209 : vector<8x128xf32>
    %212 = arith.divf %210, %211 : vector<8x128xf32>
    %213 = vector.extract_strided_slice %206 {offsets = [0, 128], sizes = [8, 128], strides = [1, 1]} : vector<8x512xf32> to vector<8x128xf32>
    %214 = arith.negf %213 : vector<8x128xf32>
    %215 = math.exp %214 : vector<8x128xf32>
    %cst_62 = arith.constant 1.000000e+00 : f32
    %216 = vector.broadcast %cst_62 : f32 to vector<8x128xf32>
    %217 = arith.addf %216, %215 : vector<8x128xf32>
    %218 = arith.divf %216, %217 : vector<8x128xf32>
    %219 = vector.extract_strided_slice %206 {offsets = [0, 256], sizes = [8, 128], strides = [1, 1]} : vector<8x512xf32> to vector<8x128xf32>
    %220 = math.tanh %219 : vector<8x128xf32>
    %221 = vector.extract_strided_slice %206 {offsets = [0, 384], sizes = [8, 128], strides = [1, 1]} : vector<8x512xf32> to vector<8x128xf32>
    %222 = arith.negf %221 : vector<8x128xf32>
    %223 = math.exp %222 : vector<8x128xf32>
    %cst_63 = arith.constant 1.000000e+00 : f32
    %224 = vector.broadcast %cst_63 : f32 to vector<8x128xf32>
    %225 = arith.addf %224, %223 : vector<8x128xf32>
    %226 = arith.divf %224, %225 : vector<8x128xf32>
    %227 = arith.mulf %218, %193 : vector<8x128xf32>
    %228 = arith.mulf %212, %220 : vector<8x128xf32>
    %229 = arith.addf %227, %228 : vector<8x128xf32>
    %230 = math.tanh %229 : vector<8x128xf32>
    %231 = arith.mulf %226, %230 : vector<8x128xf32>
    %c4_i32 = arith.constant 4 : i32
    %232 = arith.addi %11, %c4_i32 : i32
    %233 = vector.broadcast %232 : i32 to vector<8x1xi32>
    %234 = arith.cmpi slt, %233, %10 : vector<8x1xi32>
    %235 = vector.shape_cast %234 : vector<8x1xi1> to vector<8x1xi1>
    %236 = vector.broadcast %235 : vector<8x1xi1> to vector<8x128xi1>
    %237 = arith.select %236, %231, %190 : vector<8x128xi1>, vector<8x128xf32>
    %238 = vector.shape_cast %234 : vector<8x1xi1> to vector<8x1xi1>
    %239 = vector.broadcast %238 : vector<8x1xi1> to vector<8x128xi1>
    %240 = arith.select %239, %229, %193 : vector<8x128xi1>, vector<8x128xf32>
    %cst_64 = arith.constant 0.000000e+00 : f32
    %241 = vector.shape_cast %234 : vector<8x1xi1> to vector<8x1xi1>
    %242 = vector.broadcast %241 : vector<8x1xi1> to vector<8x128xi1>
    %243 = vector.broadcast %cst_64 : f32 to vector<8x128xf32>
    %244 = arith.select %242, %231, %243 : vector<8x128xi1>, vector<8x128xf32>
    %245 = arith.truncf %244 : vector<8x128xf32> to vector<8x128xbf16>
    %c4 = arith.constant 4 : index
    %c0_65 = arith.constant 0 : index
    %c0_66 = arith.constant 0 : index
    %246 = vector.load %arg6[%c4, %c0_65, %c0_66] : memref<8x8x128xbf16, #tpu.memory_space<vmem>>, vector<1x8x128xbf16>
    %247 = vector.shape_cast %246 : vector<1x8x128xbf16> to vector<8x128xbf16>
    %248 = vector.shape_cast %245 : vector<8x128xbf16> to vector<1x8x128xbf16>
    tpu.vector_store %arg6[%c4, %c0_65, %c0_66], %248 {strides = array<i32>} : memref<8x8x128xbf16, #tpu.memory_space<vmem>>, vector<1x8x128xbf16>,
    %c40 = arith.constant 40 : index
    %c0_67 = arith.constant 0 : index
    %249 = vector.load %arg9[%c40, %c0_67] : memref<64x512xf32, #tpu.memory_space<vmem>>, vector<8x512xf32>
    %250 = arith.truncf %237 : vector<8x128xf32> to vector<8x128xbf16>
    %c0_68 = arith.constant 0 : index
    %c0_69 = arith.constant 0 : index
    %251 = vector.load %arg4[%c0_68, %c0_69] : memref<128x512xbf16, #tpu.memory_space<vmem>>, vector<128x512xbf16>
    %cst_70 = arith.constant dense<0.000000e+00> : vector<8x512xf32>
    %252 = tpu.matmul %250, %251, %cst_70 {dimension_numbers = #tpu.dot_dimension_numbers<[1], [0], [0], [1], [0, 0, 1, 1], [], []>} : vector<8x128xbf16>, vector<128x512xbf16>, vector<8x512xf32> -> vector<8x512xf32>
    %253 = arith.addf %249, %252 : vector<8x512xf32>
    %254 = vector.extract_strided_slice %253 {offsets = [0, 0], sizes = [8, 128], strides = [1, 1]} : vector<8x512xf32> to vector<8x128xf32>
    %255 = arith.negf %254 : vector<8x128xf32>
    %256 = math.exp %255 : vector<8x128xf32>
    %cst_71 = arith.constant 1.000000e+00 : f32
    %257 = vector.broadcast %cst_71 : f32 to vector<8x128xf32>
    %258 = arith.addf %257, %256 : vector<8x128xf32>
    %259 = arith.divf %257, %258 : vector<8x128xf32>
    %260 = vector.extract_strided_slice %253 {offsets = [0, 128], sizes = [8, 128], strides = [1, 1]} : vector<8x512xf32> to vector<8x128xf32>
    %261 = arith.negf %260 : vector<8x128xf32>
    %262 = math.exp %261 : vector<8x128xf32>
    %cst_72 = arith.constant 1.000000e+00 : f32
    %263 = vector.broadcast %cst_72 : f32 to vector<8x128xf32>
    %264 = arith.addf %263, %262 : vector<8x128xf32>
    %265 = arith.divf %263, %264 : vector<8x128xf32>
    %266 = vector.extract_strided_slice %253 {offsets = [0, 256], sizes = [8, 128], strides = [1, 1]} : vector<8x512xf32> to vector<8x128xf32>
    %267 = math.tanh %266 : vector<8x128xf32>
    %268 = vector.extract_strided_slice %253 {offsets = [0, 384], sizes = [8, 128], strides = [1, 1]} : vector<8x512xf32> to vector<8x128xf32>
    %269 = arith.negf %268 : vector<8x128xf32>
    %270 = math.exp %269 : vector<8x128xf32>
    %cst_73 = arith.constant 1.000000e+00 : f32
    %271 = vector.broadcast %cst_73 : f32 to vector<8x128xf32>
    %272 = arith.addf %271, %270 : vector<8x128xf32>
    %273 = arith.divf %271, %272 : vector<8x128xf32>
    %274 = arith.mulf %265, %240 : vector<8x128xf32>
    %275 = arith.mulf %259, %267 : vector<8x128xf32>
    %276 = arith.addf %274, %275 : vector<8x128xf32>
    %277 = math.tanh %276 : vector<8x128xf32>
    %278 = arith.mulf %273, %277 : vector<8x128xf32>
    %c5_i32 = arith.constant 5 : i32
    %279 = arith.addi %11, %c5_i32 : i32
    %280 = vector.broadcast %279 : i32 to vector<8x1xi32>
    %281 = arith.cmpi slt, %280, %10 : vector<8x1xi32>
    %282 = vector.shape_cast %281 : vector<8x1xi1> to vector<8x1xi1>
    %283 = vector.broadcast %282 : vector<8x1xi1> to vector<8x128xi1>
    %284 = arith.select %283, %278, %237 : vector<8x128xi1>, vector<8x128xf32>
    %285 = vector.shape_cast %281 : vector<8x1xi1> to vector<8x1xi1>
    %286 = vector.broadcast %285 : vector<8x1xi1> to vector<8x128xi1>
    %287 = arith.select %286, %276, %240 : vector<8x128xi1>, vector<8x128xf32>
    %cst_74 = arith.constant 0.000000e+00 : f32
    %288 = vector.shape_cast %281 : vector<8x1xi1> to vector<8x1xi1>
    %289 = vector.broadcast %288 : vector<8x1xi1> to vector<8x128xi1>
    %290 = vector.broadcast %cst_74 : f32 to vector<8x128xf32>
    %291 = arith.select %289, %278, %290 : vector<8x128xi1>, vector<8x128xf32>
    %292 = arith.truncf %291 : vector<8x128xf32> to vector<8x128xbf16>
    %c5 = arith.constant 5 : index
    %c0_75 = arith.constant 0 : index
    %c0_76 = arith.constant 0 : index
    %293 = vector.load %arg6[%c5, %c0_75, %c0_76] : memref<8x8x128xbf16, #tpu.memory_space<vmem>>, vector<1x8x128xbf16>
    %294 = vector.shape_cast %293 : vector<1x8x128xbf16> to vector<8x128xbf16>
    %295 = vector.shape_cast %292 : vector<8x128xbf16> to vector<1x8x128xbf16>
    tpu.vector_store %arg6[%c5, %c0_75, %c0_76], %295 {strides = array<i32>} : memref<8x8x128xbf16, #tpu.memory_space<vmem>>, vector<1x8x128xbf16>,
    %c48 = arith.constant 48 : index
    %c0_77 = arith.constant 0 : index
    %296 = vector.load %arg9[%c48, %c0_77] : memref<64x512xf32, #tpu.memory_space<vmem>>, vector<8x512xf32>
    %297 = arith.truncf %284 : vector<8x128xf32> to vector<8x128xbf16>
    %c0_78 = arith.constant 0 : index
    %c0_79 = arith.constant 0 : index
    %298 = vector.load %arg4[%c0_78, %c0_79] : memref<128x512xbf16, #tpu.memory_space<vmem>>, vector<128x512xbf16>
    %cst_80 = arith.constant dense<0.000000e+00> : vector<8x512xf32>
    %299 = tpu.matmul %297, %298, %cst_80 {dimension_numbers = #tpu.dot_dimension_numbers<[1], [0], [0], [1], [0, 0, 1, 1], [], []>} : vector<8x128xbf16>, vector<128x512xbf16>, vector<8x512xf32> -> vector<8x512xf32>
    %300 = arith.addf %296, %299 : vector<8x512xf32>
    %301 = vector.extract_strided_slice %300 {offsets = [0, 0], sizes = [8, 128], strides = [1, 1]} : vector<8x512xf32> to vector<8x128xf32>
    %302 = arith.negf %301 : vector<8x128xf32>
    %303 = math.exp %302 : vector<8x128xf32>
    %cst_81 = arith.constant 1.000000e+00 : f32
    %304 = vector.broadcast %cst_81 : f32 to vector<8x128xf32>
    %305 = arith.addf %304, %303 : vector<8x128xf32>
    %306 = arith.divf %304, %305 : vector<8x128xf32>
    %307 = vector.extract_strided_slice %300 {offsets = [0, 128], sizes = [8, 128], strides = [1, 1]} : vector<8x512xf32> to vector<8x128xf32>
    %308 = arith.negf %307 : vector<8x128xf32>
    %309 = math.exp %308 : vector<8x128xf32>
    %cst_82 = arith.constant 1.000000e+00 : f32
    %310 = vector.broadcast %cst_82 : f32 to vector<8x128xf32>
    %311 = arith.addf %310, %309 : vector<8x128xf32>
    %312 = arith.divf %310, %311 : vector<8x128xf32>
    %313 = vector.extract_strided_slice %300 {offsets = [0, 256], sizes = [8, 128], strides = [1, 1]} : vector<8x512xf32> to vector<8x128xf32>
    %314 = math.tanh %313 : vector<8x128xf32>
    %315 = vector.extract_strided_slice %300 {offsets = [0, 384], sizes = [8, 128], strides = [1, 1]} : vector<8x512xf32> to vector<8x128xf32>
    %316 = arith.negf %315 : vector<8x128xf32>
    %317 = math.exp %316 : vector<8x128xf32>
    %cst_83 = arith.constant 1.000000e+00 : f32
    %318 = vector.broadcast %cst_83 : f32 to vector<8x128xf32>
    %319 = arith.addf %318, %317 : vector<8x128xf32>
    %320 = arith.divf %318, %319 : vector<8x128xf32>
    %321 = arith.mulf %312, %287 : vector<8x128xf32>
    %322 = arith.mulf %306, %314 : vector<8x128xf32>
    %323 = arith.addf %321, %322 : vector<8x128xf32>
    %324 = math.tanh %323 : vector<8x128xf32>
    %325 = arith.mulf %320, %324 : vector<8x128xf32>
    %c6_i32 = arith.constant 6 : i32
    %326 = arith.addi %11, %c6_i32 : i32
    %327 = vector.broadcast %326 : i32 to vector<8x1xi32>
    %328 = arith.cmpi slt, %327, %10 : vector<8x1xi32>
    %329 = vector.shape_cast %328 : vector<8x1xi1> to vector<8x1xi1>
    %330 = vector.broadcast %329 : vector<8x1xi1> to vector<8x128xi1>
    %331 = arith.select %330, %325, %284 : vector<8x128xi1>, vector<8x128xf32>
    %332 = vector.shape_cast %328 : vector<8x1xi1> to vector<8x1xi1>
    %333 = vector.broadcast %332 : vector<8x1xi1> to vector<8x128xi1>
    %334 = arith.select %333, %323, %287 : vector<8x128xi1>, vector<8x128xf32>
    %cst_84 = arith.constant 0.000000e+00 : f32
    %335 = vector.shape_cast %328 : vector<8x1xi1> to vector<8x1xi1>
    %336 = vector.broadcast %335 : vector<8x1xi1> to vector<8x128xi1>
    %337 = vector.broadcast %cst_84 : f32 to vector<8x128xf32>
    %338 = arith.select %336, %325, %337 : vector<8x128xi1>, vector<8x128xf32>
    %339 = arith.truncf %338 : vector<8x128xf32> to vector<8x128xbf16>
    %c6 = arith.constant 6 : index
    %c0_85 = arith.constant 0 : index
    %c0_86 = arith.constant 0 : index
    %340 = vector.load %arg6[%c6, %c0_85, %c0_86] : memref<8x8x128xbf16, #tpu.memory_space<vmem>>, vector<1x8x128xbf16>
    %341 = vector.shape_cast %340 : vector<1x8x128xbf16> to vector<8x128xbf16>
    %342 = vector.shape_cast %339 : vector<8x128xbf16> to vector<1x8x128xbf16>
    tpu.vector_store %arg6[%c6, %c0_85, %c0_86], %342 {strides = array<i32>} : memref<8x8x128xbf16, #tpu.memory_space<vmem>>, vector<1x8x128xbf16>,
    %c56 = arith.constant 56 : index
    %c0_87 = arith.constant 0 : index
    %343 = vector.load %arg9[%c56, %c0_87] : memref<64x512xf32, #tpu.memory_space<vmem>>, vector<8x512xf32>
    %344 = arith.truncf %331 : vector<8x128xf32> to vector<8x128xbf16>
    %c0_88 = arith.constant 0 : index
    %c0_89 = arith.constant 0 : index
    %345 = vector.load %arg4[%c0_88, %c0_89] : memref<128x512xbf16, #tpu.memory_space<vmem>>, vector<128x512xbf16>
    %cst_90 = arith.constant dense<0.000000e+00> : vector<8x512xf32>
    %346 = tpu.matmul %344, %345, %cst_90 {dimension_numbers = #tpu.dot_dimension_numbers<[1], [0], [0], [1], [0, 0, 1, 1], [], []>} : vector<8x128xbf16>, vector<128x512xbf16>, vector<8x512xf32> -> vector<8x512xf32>
    %347 = arith.addf %343, %346 : vector<8x512xf32>
    %348 = vector.extract_strided_slice %347 {offsets = [0, 0], sizes = [8, 128], strides = [1, 1]} : vector<8x512xf32> to vector<8x128xf32>
    %349 = arith.negf %348 : vector<8x128xf32>
    %350 = math.exp %349 : vector<8x128xf32>
    %cst_91 = arith.constant 1.000000e+00 : f32
    %351 = vector.broadcast %cst_91 : f32 to vector<8x128xf32>
    %352 = arith.addf %351, %350 : vector<8x128xf32>
    %353 = arith.divf %351, %352 : vector<8x128xf32>
    %354 = vector.extract_strided_slice %347 {offsets = [0, 128], sizes = [8, 128], strides = [1, 1]} : vector<8x512xf32> to vector<8x128xf32>
    %355 = arith.negf %354 : vector<8x128xf32>
    %356 = math.exp %355 : vector<8x128xf32>
    %cst_92 = arith.constant 1.000000e+00 : f32
    %357 = vector.broadcast %cst_92 : f32 to vector<8x128xf32>
    %358 = arith.addf %357, %356 : vector<8x128xf32>
    %359 = arith.divf %357, %358 : vector<8x128xf32>
    %360 = vector.extract_strided_slice %347 {offsets = [0, 256], sizes = [8, 128], strides = [1, 1]} : vector<8x512xf32> to vector<8x128xf32>
    %361 = math.tanh %360 : vector<8x128xf32>
    %362 = vector.extract_strided_slice %347 {offsets = [0, 384], sizes = [8, 128], strides = [1, 1]} : vector<8x512xf32> to vector<8x128xf32>
    %363 = arith.negf %362 : vector<8x128xf32>
    %364 = math.exp %363 : vector<8x128xf32>
    %cst_93 = arith.constant 1.000000e+00 : f32
    %365 = vector.broadcast %cst_93 : f32 to vector<8x128xf32>
    %366 = arith.addf %365, %364 : vector<8x128xf32>
    %367 = arith.divf %365, %366 : vector<8x128xf32>
    %368 = arith.mulf %359, %334 : vector<8x128xf32>
    %369 = arith.mulf %353, %361 : vector<8x128xf32>
    %370 = arith.addf %368, %369 : vector<8x128xf32>
    %371 = math.tanh %370 : vector<8x128xf32>
    %372 = arith.mulf %367, %371 : vector<8x128xf32>
    %c7_i32 = arith.constant 7 : i32
    %373 = arith.addi %11, %c7_i32 : i32
    %374 = vector.broadcast %373 : i32 to vector<8x1xi32>
    %375 = arith.cmpi slt, %374, %10 : vector<8x1xi32>
    %376 = vector.shape_cast %375 : vector<8x1xi1> to vector<8x1xi1>
    %377 = vector.broadcast %376 : vector<8x1xi1> to vector<8x128xi1>
    %378 = arith.select %377, %372, %331 : vector<8x128xi1>, vector<8x128xf32>
    %379 = vector.shape_cast %375 : vector<8x1xi1> to vector<8x1xi1>
    %380 = vector.broadcast %379 : vector<8x1xi1> to vector<8x128xi1>
    %381 = arith.select %380, %370, %334 : vector<8x128xi1>, vector<8x128xf32>
    %cst_94 = arith.constant 0.000000e+00 : f32
    %382 = vector.shape_cast %375 : vector<8x1xi1> to vector<8x1xi1>
    %383 = vector.broadcast %382 : vector<8x1xi1> to vector<8x128xi1>
    %384 = vector.broadcast %cst_94 : f32 to vector<8x128xf32>
    %385 = arith.select %383, %372, %384 : vector<8x128xi1>, vector<8x128xf32>
    %386 = arith.truncf %385 : vector<8x128xf32> to vector<8x128xbf16>
    %c7 = arith.constant 7 : index
    %c0_95 = arith.constant 0 : index
    %c0_96 = arith.constant 0 : index
    %387 = vector.load %arg6[%c7, %c0_95, %c0_96] : memref<8x8x128xbf16, #tpu.memory_space<vmem>>, vector<1x8x128xbf16>
    %388 = vector.shape_cast %387 : vector<1x8x128xbf16> to vector<8x128xbf16>
    %389 = vector.shape_cast %386 : vector<8x128xbf16> to vector<1x8x128xbf16>
    tpu.vector_store %arg6[%c7, %c0_95, %c0_96], %389 {strides = array<i32>} : memref<8x8x128xbf16, #tpu.memory_space<vmem>>, vector<1x8x128xbf16>,
    %c0_97 = arith.constant 0 : index
    %c0_98 = arith.constant 0 : index
    %390 = vector.load %arg7[%c0_97, %c0_98] : memref<8x128xf32, #tpu.memory_space<vmem>>, vector<8x128xf32>
    tpu.vector_store %arg7[%c0_97, %c0_98], %378 {strides = array<i32>} : memref<8x128xf32, #tpu.memory_space<vmem>>, vector<8x128xf32>,
    %c0_99 = arith.constant 0 : index
    %c0_100 = arith.constant 0 : index
    %391 = vector.load %arg8[%c0_99, %c0_100] : memref<8x128xf32, #tpu.memory_space<vmem>>, vector<8x128xf32>
    tpu.vector_store %arg8[%c0_99, %c0_100], %381 {strides = array<i32>} : memref<8x128xf32, #tpu.memory_space<vmem>>, vector<8x128xf32>,
    return
  }
  func.func @transform_0(%arg0: i32) -> (i32, i32) {
    %c0_i32 = arith.constant 0 : i32
    %c0_i32_0 = arith.constant 0 : i32
    %c0_i32_1 = arith.constant 0 : i32
    return %c0_i32, %c0_i32_0 : i32, i32
  }
  func.func @transform_1(%arg0: i32) -> (i32, i32) {
    %c0_i32 = arith.constant 0 : i32
    %c0_i32_0 = arith.constant 0 : i32
    return %arg0, %c0_i32 : i32, i32
  }
  func.func @transform_2(%arg0: i32) -> (i32, i32) {
    %c0_i32 = arith.constant 0 : i32
    %c0_i32_0 = arith.constant 0 : i32
    %c0_i32_1 = arith.constant 0 : i32
    return %c0_i32, %c0_i32_0 : i32, i32
  }
  func.func @transform_3(%arg0: i32) -> (i32, i32) {
    %c0_i32 = arith.constant 0 : i32
    %c0_i32_0 = arith.constant 0 : i32
    %c0_i32_1 = arith.constant 0 : i32
    return %c0_i32, %c0_i32_0 : i32, i32
  }
  func.func @transform_4(%arg0: i32) -> (i32, i32) {
    %c0_i32 = arith.constant 0 : i32
    %c0_i32_0 = arith.constant 0 : i32
    %c0_i32_1 = arith.constant 0 : i32
    return %c0_i32, %c0_i32_0 : i32, i32
  }
  func.func @transform_5(%arg0: i32) -> (i32, i32, i32) {
    %c0_i32 = arith.constant 0 : i32
    %c0_i32_0 = arith.constant 0 : i32
    %c0_i32_1 = arith.constant 0 : i32
    return %arg0, %c0_i32, %c0_i32_0 : i32, i32, i32
  }
  func.func @transform_6(%arg0: i32) -> (i32, i32) {
    %c0_i32 = arith.constant 0 : i32
    %c0_i32_0 = arith.constant 0 : i32
    %c0_i32_1 = arith.constant 0 : i32
    return %c0_i32, %c0_i32_0 : i32, i32
  }
}

</mosaic_0001>

<bundles_post_ra>
// kernel: tpu_custom_call.1
= control target key start
LH: loop header
LB: loop body
LE: loop exit
PB: predicated region body
PF: predicated region fallthrough
CT: control target
= control target key end

     0   :  { %12 = vsyncpa [#allocation5], 0  ;;  %s4239_s0 = inlined_call_operand.vmem [shape: s32[8,1], index: 0, kind: input, shape index: {}]   ;;  %s4240_s1 = inlined_call_operand.vmem [shape: bf16[64,16], index: 1, kind: input, shape index: {}]   ;;  %s4241_s2 = inlined_call_operand.vmem [shape: bf16[16,512], index: 2, kind: input, shape index: {}]   ;;  %s4242_s3 = inlined_call_operand.hbm [shape: bf16[128,512], index: 3, kind: input, shape index: {}]   ;;  %s4243_s4 = inlined_call_operand.vmem [shape: f32[1,512], index: 4, kind: input, shape index: {}]   ;;  %s4244_s5 = inlined_call_operand.hbm [shape: bf16[8,8,128], index: 5, kind: output, shape index: {0}]   ;;  %s4245_s6 = inlined_call_operand.hbm [shape: f32[8,128], index: 6, kind: output, shape index: {1}]  }
   0x1   :  { %13 = vsyncpa [#allocation6], 0 }
   0x2   :  { %14 = vsyncpa [#allocation9], 0  ;;  %s3582_s21 = smov [#allocation4]  }
   0x3   :  { %s26_s22 = sshll.u32 %s3582_s21, 4  ;;  %s27_s22 = int_to_ptr.vmem [resolvable:$true] %s26_s22 }
   0x4   :  { %s3524_s23 = scalar_lea.vmem %s27_s22, 4096  ;;  %p3529_p1 = scmp.lt.s32.totalorder %s27_s22, %s27_s22 }
   0x5   :  { %p3525_p0 = scmp.ne.s32.totalorder %s27_s22, %s3524_s23  ;;  %p3530_p2 = scmp.lt.s32.totalorder %s3524_s23, %s3524_s23 }
   0x7   :  { %p3531_p3 = por %p3530_p2, %p3529_p1 }
   0x9   :  { %p3532_p4 = pnand %p3531_p3, %p3525_p0 }
   0xb   :  { %3535 = shalt.err (!%p3532_p4)
}
   0xc   :  { %s3583_s24 = smov 256   ;;  %s3584_s25 = smov 16  }
   0xd   :  { %32 = dma.hbm_to_vmem [thread:$0]  %s4242_s3, 4096, %s27_s22, [#allocation5], %s3583_s24, %s3583_s24, %s3584_s25  }
   0xe   :  { %3576 = dma.done.wait [#allocation5], 4096  }
   0xf   :  { %3577 = vsyncadd [#allocation5], 4294963200  ;;  %v4246_v0 = vmov 0   ;;  %v3228_v1 = vld [vmem:[%s4241_s2 + $0x4] ss:$16 sps:$4 sm:$0xff]   ;;  %vm119_vm0 = vcmask 130048   ;;  %v59_v47 = vlaneseq }
  0x10   :  { %164 = vmatprep.mubr.bf16.mxu0 %v4246_v0  ;;  %237 = vmatprep.mubr.bf16.mxu1 %v4246_v0  ;;  %v3230_v2 = vld [vmem:[%s4241_s2 + $0xc] ss:$16 sps:$4 sm:$0xff]   ;;  %v3232_v3 = vld [vmem:[%s4241_s2] ss:$16 sps:$4 sm:$0xff]   ;;  %v3233_v4 = vld [vmem:[%s4241_s2 + $0x8] ss:$16 sps:$4 sm:$0xff]  }
  0x11   :  { %3226 = vset.pattern.permute.xlu0 %v4246_v0  ;;  %3227 = vset.pattern.permute.xlu1 %v4246_v0  ;;  %v3234_v5 = vld [vmem:[%s4240_s1] sm:$0xff]   ;;  %v3652_v8 = vld [vmem:[#allocation4 + $0xe8] ss:$16 sps:$4 sm:$0xff]   ;;  %v3655_v9 = vld [vmem:[#allocation4 + $0xec] ss:$16 sps:$4 sm:$0xff]   ;;  %v3586_v44 = vmov 0.0|0.0  }
  0x12   :  { %146 = vmatprep.subr.bf16.mxu0 %v3228_v1  ;;  %219 = vmatprep.subr.bf16.mxu1 %v3230_v2  ;;  %v3648_v6 = vld [vmem:[#allocation4 + $0xe0] ss:$16 sps:$4 sm:$0xff]   ;;  %v3650_v7 = vld [vmem:[#allocation4 + $0xe4] ss:$16 sps:$4 sm:$0xff]   ;;  %v3665_v12 = vld [vmem:[#allocation4 + $0xcc] ss:$16 sps:$4 sm:$0xff]  }
  0x13   :  { %147 = vmatpush1.bf16.msra.mxu0 %v3232_v3  ;;  %220 = vmatpush1.bf16.msra.mxu1 %v3233_v4  ;;  %v3659_v10 = vld [vmem:[#allocation4 + $0xc4] ss:$16 sps:$4 sm:$0xff]   ;;  %v3663_v11 = vld [vmem:[#allocation4 + $0xc0] ss:$16 sps:$4 sm:$0xff]   ;;  %v3669_v13 = vld [vmem:[#allocation4 + $0xc8] ss:$16 sps:$4 sm:$0xff]  }
  0x14   :  { %511 = vmatprep.subr.bf16.mxu0 %v3650_v7  ;;  %552 = vmatprep.subr.bf16.mxu1 %v3655_v9  ;;  %v3247_v14 = vld [vmem:[%s4240_s1 + $0x8] sm:$0xff]   ;;  %v3677_v15 = vld [vmem:[#allocation4 + $0xa4] ss:$16 sps:$4 sm:$0xff]   ;;  %v3680_v16 = vld [vmem:[#allocation4 + $0xa0] ss:$16 sps:$4 sm:$0xff]   ;;  %v60_v48 = vshrl.u32 %v59_v47, 7 }
  0x15   :  { %v3682_v17 = vld [vmem:[#allocation4 + $0xac] ss:$16 sps:$4 sm:$0xff]   ;;  %v3686_v18 = vld [vmem:[#allocation4 + $0xa8] ss:$16 sps:$4 sm:$0xff]   ;;  %v3688_v19 = vld [vmem:[#allocation4 + $0x84] ss:$16 sps:$4 sm:$0xff]  }
  0x16   :  { %2921 = vmatmul.mubr.msk.bf16.vlgmr.msra.gmra.mxu0 %vm119_vm0, %v3234_v5  ;;  %2925 = vmatmul.mubr.msk.bf16.vlgmr.msra.gmra.mxu1 %vm119_vm0, %v3234_v5  ;;  %v3693_v20 = vld [vmem:[#allocation4 + $0x8c] ss:$16 sps:$4 sm:$0xff]   ;;  %v3696_v21 = vld [vmem:[#allocation4 + $0x80] ss:$16 sps:$4 sm:$0xff]   ;;  %v3701_v22 = vld [vmem:[#allocation4 + $0x88] ss:$16 sps:$4 sm:$0xff]  }
  0x17   :  { %512 = vmatpush1.bf16.msra.mxu0 %v3648_v6  ;;  %553 = vmatpush1.bf16.msra.mxu1 %v3652_v8  ;;  %v3703_v23 = vld [vmem:[#allocation4 + $0x64] ss:$16 sps:$4 sm:$0xff]   ;;  %v3707_v24 = vld [vmem:[#allocation4 + $0x6c] ss:$16 sps:$4 sm:$0xff]   ;;  %v3713_v26 = vld [vmem:[#allocation4 + $0x60] ss:$16 sps:$4 sm:$0xff]  }
  0x18   :  { %513 = vmatprep.subr.bf16.mxu0 %v3659_v10  ;;  %554 = vmatprep.subr.bf16.mxu1 %v3665_v12  ;;  %v3260_v25 = vld [vmem:[%s4240_s1 + $0x10] sm:$0xff]   ;;  %v3717_v27 = vld [vmem:[#allocation4 + $0x68] ss:$16 sps:$4 sm:$0xff]   ;;  %v3722_v29 = vld [vmem:[#allocation4 + $0x4c] ss:$16 sps:$4 sm:$0xff]   ;;  %v69_v49 = vsub.s32 2, %v60_v48 }
  0x19   :  { %174 = vmatprep.mubr.bf16.mxu0 %v4246_v0  ;;  %247 = vmatprep.mubr.bf16.mxu1 %v4246_v0  ;;  %v3719_v28 = vld [vmem:[#allocation4 + $0x44] ss:$16 sps:$4 sm:$0xff]   ;;  %v3726_v30 = vld [vmem:[#allocation4 + $0x40] ss:$16 sps:$4 sm:$0xff]   ;;  %v3729_v31 = vld [vmem:[#allocation4 + $0x48] ss:$16 sps:$4 sm:$0xff]  }
  0x1a   :  { %v3734_v32 = vld [vmem:[#allocation4 + $0x24] ss:$16 sps:$4 sm:$0xff]   ;;  %v3738_v33 = vld [vmem:[#allocation4 + $0x2c] ss:$16 sps:$4 sm:$0xff]   ;;  %v3743_v35 = vld [vmem:[#allocation4 + $0x20] ss:$16 sps:$4 sm:$0xff]  }
  0x1b   :  { %514 = vmatpush1.bf16.msra.mxu0 %v3663_v11  ;;  %555 = vmatpush1.bf16.msra.mxu1 %v3669_v13  ;;  %v3273_v34 = vld [vmem:[%s4240_s1 + $0x18] sm:$0xff]   ;;  %v3751_v37 = vld [vmem:[%s4239_s0] sm:$0xff]  ;;  %v61_v50 = vsub.s32 0, %v60_v48  ;;  %v73_v51 = vsub.s32 3, %v60_v48  ;;  %v65_v56 = vsub.s32 1, %v60_v48  ;;  %s3588_s21 = smov [#allocation7]  }
  0x1c   :  { %515 = vmatprep.subr.bf16.mxu0 %v3677_v15  ;;  %556 = vmatprep.subr.bf16.mxu1 %v3682_v17  ;;  %v3746_v36 = vld [vmem:[#allocation4 + $0x28] ss:$16 sps:$4 sm:$0xff]   ;;  %v3755_v38 = vld [vmem:[#allocation4 + $0x4] ss:$16 sps:$4 sm:$0xff]   ;;  %vm2964_vm1 = vcmp.gt.s32.totalorder %v3751_v37, 0  ;;  %vm3000_vm2 = vcmp.gt.s32.totalorder %v3751_v37, 1 }
  0x1d   :  { %v3759_v39 = vld [vmem:[#allocation4] ss:$16 sps:$4 sm:$0xff]   ;;  %v3761_v40 = vld [vmem:[#allocation4 + $0xc] ss:$16 sps:$4 sm:$0xff]   ;;  %v3765_v41 = vld [vmem:[#allocation4 + $0x8] ss:$16 sps:$4 sm:$0xff]  }
  0x1e   :  { %2922 = vmatmul.mubr.msk.bf16.gmra.mxu0 %vm119_vm0, %v3247_v14  ;;  %2926 = vmatmul.mubr.msk.bf16.gmra.mxu1 %vm119_vm0, %v3247_v14  ;;  %v623_v42 = vsel %vm2964_vm1, 1, %v4246_v0  ;;  %v943_v43 = vsel %vm3000_vm2, 1, %v4246_v0  ;;  %vm3108_vm3 = vcmp.gt.s32.totalorder %v3751_v37, 4  ;;  %vm3180_vm4 = vcmp.gt.s32.totalorder %v3751_v37, 6  ;;  %v57_v52 = vld [vmem:[%s4243_s4] sm:$0xf] }
  0x1f   :  { %516 = vmatpush1.bf16.msra.mxu0 %v3680_v16  ;;  %184 = vmatprep.mubr.bf16.mxu0 %v4246_v0  ;;  %v1906_v45 = vsel %vm3108_vm3, 1, %v4246_v0  ;;  %v2548_v46 = vsel %vm3180_vm4, 1, %v4246_v0  ;;  %v3825_v55 = vrot.slane %v57_v52, %v69_v49  ;;  %v62_v59 = vrot.slane %v57_v52, %v61_v50  ;;  %s3587_s4 = smov [#allocation8]   ;;  %s2887_s22 = sshll.u32 %s3588_s21, 4  ;;  %s2888_s22 = int_to_ptr.vmem [resolvable:$true] %s2887_s22 }
  0x20   :  { %557 = vmatpush1.bf16.msra.mxu1 %v3686_v18  ;;  %517 = vmatprep.subr.bf16.mxu0 %v3688_v19  ;;  %v3831_v60 = vrot.slane %v57_v52, %v73_v51  ;;  %v66_v63 = vrot.slane %v57_v52, %v65_v56  ;;  %vm3036_vm7 = vcmp.gt.s32.totalorder %v3751_v37, 2  ;;  %vm3072_vm8 = vcmp.gt.s32.totalorder %v3751_v37, 3  ;;  %s2900_s20 = sshll.u32 %s3587_s4, 4  ;;  %s2901_s20 = int_to_ptr.vmem [resolvable:$true] %s2900_s20 }
  0x21   :  { %558 = vmatprep.subr.bf16.mxu1 %v3693_v20  ;;  %257 = vmatprep.mubr.bf16.mxu1 %v4246_v0  ;;  %vm3144_vm9 = vcmp.gt.s32.totalorder %v3751_v37, 5  ;;  %vm3216_vm10 = vcmp.gt.s32.totalorder %v3751_v37, 7  ;;  %s3536_s23 = scalar_lea.vmem %s2901_s20, 128  ;;  %p3541_p6 = scmp.lt.s32.totalorder %s2901_s20, %s2901_s20 }
  0x22   :  { %625 = vperm.xlu0 %3226, %v623_v42   ;;  %p3537_p5 = scmp.ne.s32.totalorder %s2901_s20, %s3536_s23  ;;  %p3542_p7 = scmp.lt.s32.totalorder %s3536_s23, %s3536_s23 }
  0x23   :  { %518 = vmatpush1.bf16.msra.mxu0 %v3696_v21 }
  0x24   :  { %559 = vmatpush1.bf16.msra.mxu1 %v3701_v22  ;;  %519 = vmatprep.subr.bf16.mxu0 %v3703_v23  ;;  %p3543_p8 = por %p3542_p7, %p3541_p6 }
  0x25   :  { %560 = vmatprep.subr.bf16.mxu1 %v3707_v24 }
  0x26   :  { %2923 = vmatmul.mubr.msk.bf16.gmra.mxu0 %vm119_vm0, %v3260_v25  ;;  %2927 = vmatmul.mubr.msk.bf16.gmra.mxu1 %vm119_vm0, %v3260_v25  ;;  %p3544_p9 = pnand %p3543_p8, %p3537_p5 }
  0x27   :  { %520 = vmatpush1.bf16.msra.mxu0 %v3713_v26  ;;  %194 = vmatprep.mubr.bf16.mxu0 %v4246_v0 }
  0x28   :  { %561 = vmatpush1.bf16.msra.mxu1 %v3717_v27  ;;  %521 = vmatprep.subr.bf16.mxu0 %v3719_v28 }
  0x29   :  { %562 = vmatprep.subr.bf16.mxu1 %v3722_v29  ;;  %267 = vmatprep.mubr.bf16.mxu1 %v4246_v0 }
  0x2a   :  { %945 = vperm.xlu0 %3226, %v943_v43  }
  0x2b   :  { %522 = vmatpush1.bf16.msra.mxu0 %v3726_v30 }
  0x2c   :  { %563 = vmatpush1.bf16.msra.mxu1 %v3729_v31  ;;  %523 = vmatprep.subr.bf16.mxu0 %v3734_v32 }
  0x2d   :  { %564 = vmatprep.subr.bf16.mxu1 %v3738_v33 }
  0x2e   :  { %2924 = vmatmul.mubr.msk.bf16.gmra.mxu0 %vm119_vm0, %v3273_v34  ;;  %2928 = vmatmul.mubr.msk.bf16.gmra.mxu1 %vm119_vm0, %v3273_v34 }
  0x2f   :  { %524 = vmatpush1.bf16.msra.mxu0 %v3743_v35  ;;  %543 = vmatprep.mubr.bf16.mxu0 %v4246_v0 }
  0x30   :  { %565 = vmatpush1.bf16.msra.mxu1 %v3746_v36  ;;  %525 = vmatprep.subr.bf16.mxu0 %v3755_v38 }
  0x31   :  { %566 = vmatprep.subr.bf16.mxu1 %v3761_v40  ;;  %584 = vmatprep.mubr.bf16.mxu1 %v4246_v0 }
  0x32   :  { %1908 = vperm.xlu0 %3226, %v1906_v45  }
  0x33   :  { %526 = vmatpush1.bf16.msra.mxu0 %v3759_v39 }
  0x34   :  { %567 = vmatpush1.bf16.msra.mxu1 %v3765_v41  ;;  %830 = vmatprep.subr.bf16.mxu0 %v3650_v7 }
  0x35   :  { %871 = vmatprep.subr.bf16.mxu1 %v3655_v9 }
  0x36   :  { %544 = vmatmul.mubr.bf16.vlgmr.msra.gmra.mxu0 %v3586_v44  ;;  %2550 = vperm.xlu0 %3226, %v2548_v46  }
  0x37   :  { %585 = vmatmul.mubr.bf16.vlgmr.msra.gmra.mxu1 %v3586_v44  ;;  %831 = vmatpush1.bf16.msra.mxu0 %v3648_v6 }
  0x38   :  { %872 = vmatpush1.bf16.msra.mxu1 %v3652_v8  ;;  %832 = vmatprep.subr.bf16.mxu0 %v3659_v10 }
  0x39   :  { %873 = vmatprep.subr.bf16.mxu1 %v3665_v12  ;;  %862 = vmatprep.mubr.bf16.mxu0 %v4246_v0 }
  0x3a   :  { %903 = vmatprep.mubr.bf16.mxu1 %v4246_v0 }
  0x3b   :  { %833 = vmatpush1.bf16.msra.mxu0 %v3663_v11 }
  0x3c   :  { %874 = vmatpush1.bf16.msra.mxu1 %v3669_v13  ;;  %834 = vmatprep.subr.bf16.mxu0 %v3677_v15 }
  0x3d   :  { %875 = vmatprep.subr.bf16.mxu1 %v3682_v17 }
  0x3f   :  { %835 = vmatpush1.bf16.msra.mxu0 %v3680_v16 }
  0x40   :  { %876 = vmatpush1.bf16.msra.mxu1 %v3686_v18  ;;  %836 = vmatprep.subr.bf16.mxu0 %v3688_v19 }
  0x41   :  { %877 = vmatprep.subr.bf16.mxu1 %v3693_v20 }
  0x43   :  { %837 = vmatpush1.bf16.msra.mxu0 %v3696_v21 }
  0x44   :  { %878 = vmatpush1.bf16.msra.mxu1 %v3701_v22  ;;  %838 = vmatprep.subr.bf16.mxu0 %v3703_v23 }
  0x45   :  { %879 = vmatprep.subr.bf16.mxu1 %v3707_v24 }
  0x47   :  { %839 = vmatpush1.bf16.msra.mxu0 %v3713_v26 }
  0x48   :  { %880 = vmatpush1.bf16.msra.mxu1 %v3717_v27  ;;  %840 = vmatprep.subr.bf16.mxu0 %v3719_v28 }
  0x49   :  { %881 = vmatprep.subr.bf16.mxu1 %v3722_v29 }
  0x4b   :  { %841 = vmatpush1.bf16.msra.mxu0 %v3726_v30 }
  0x4c   :  { %882 = vmatpush1.bf16.msra.mxu1 %v3729_v31  ;;  %842 = vmatprep.subr.bf16.mxu0 %v3734_v32 }
  0x4d   :  { %883 = vmatprep.subr.bf16.mxu1 %v3738_v33 }
  0x4f   :  { %843 = vmatpush1.bf16.msra.mxu0 %v3743_v35 }
  0x50   :  { %884 = vmatpush1.bf16.msra.mxu1 %v3746_v36  ;;  %844 = vmatprep.subr.bf16.mxu0 %v3755_v38 }
  0x51   :  { %885 = vmatprep.subr.bf16.mxu1 %v3761_v40 }
  0x53   :  { %845 = vmatpush1.bf16.msra.mxu0 %v3759_v39 }
  0x54   :  { %886 = vmatpush1.bf16.msra.mxu1 %v3765_v41  ;;  %1151 = vmatprep.subr.bf16.mxu0 %v3650_v7 }
  0x55   :  { %1192 = vmatprep.subr.bf16.mxu1 %v3655_v9 }
  0xd6   :  { %v3821_v53 = vpop.f32.mrf.mxu0  ;;  %v3823_v54 = vpop.f32.mrf.mxu1 }
  0xd8   :  { %v3827_v57 = vpop.f32.mrf.mxu0  ;;  %v3829_v58 = vpop.f32.mrf.mxu1 }
  0xda   :  { %v170_v61 = vpop.f32.mrf.mxu0  ;;  %v243_v62 = vpop.f32.mrf.mxu1 }
  0xdb   :  { %v3833_v1 = vadd.f32 %v170_v61, %v62_v59  ;;  %v3836_v2 = vadd.f32 %v243_v62, %v3825_v55 }
  0xdc   :  { %v172_v3 = vpop.f32.mrf.mxu0  ;;  %v245_v4 = vpop.f32.mrf.mxu1 }
  0xdd   :  { %v3838_v5 = vadd.f32 %v172_v3, %v66_v63  ;;  %v3841_v7 = vadd.f32 %v245_v4, %v3831_v60 }
  0xde   :  { %v176_v9 = vpop.f32.mrf.mxu0  ;;  %v249_v14 = vpop.f32.mrf.mxu1 }
  0xdf   :  { %v3843_v25 = vadd.f32 %v176_v9, %v62_v59  ;;  %v3846_v34 = vadd.f32 %v249_v14, %v3825_v55 }
  0xe0   :  { %v178_v42 = vpop.f32.mrf.mxu0  ;;  %v251_v43 = vpop.f32.mrf.mxu1 }
  0xe1   :  { %v3848_v44 = vadd.f32 %v178_v42, %v66_v63  ;;  %v3851_v45 = vadd.f32 %v251_v43, %v3831_v60 }
  0xe2   :  { %v180_v46 = vpop.f32.mrf.mxu0  ;;  %v253_v47 = vpop.f32.mrf.mxu1 }
  0xe3   :  { %v3853_v48 = vadd.f32 %v180_v46, %v62_v59  ;;  %v3856_v49 = vadd.f32 %v253_v47, %v3825_v55 }
  0xe4   :  { %v182_v50 = vpop.f32.mrf.mxu0  ;;  %v255_v51 = vpop.f32.mrf.mxu1 }
  0xe5   :  { %4248 = vst [vmem:[#allocation13_spill] sm:$0xff] %v3853_v48  ;;  %4249 = vst [vmem:[#allocation14_spill] sm:$0xff] %v3856_v49  ;;  %v3858_v52 = vadd.f32 %v182_v50, %v66_v63  ;;  %v3861_v56 = vadd.f32 %v255_v51, %v3831_v60 }
  0xe6   :  { %v186_v61 = vpop.f32.mrf.mxu0  ;;  %v259_v62 = vpop.f32.mrf.mxu1 }
  0xe7   :  { %4250 = vst [vmem:[#allocation15_spill] sm:$0xff] %v3858_v52  ;;  %4251 = vst [vmem:[#allocation16_spill] sm:$0xff] %v3861_v56  ;;  %v3863_v3 = vadd.f32 %v186_v61, %v62_v59  ;;  %v3866_v4 = vadd.f32 %v259_v62, %v3825_v55 }
  0xe8   :  { %v188_v9 = vpop.f32.mrf.mxu0  ;;  %v261_v14 = vpop.f32.mrf.mxu1 }
  0xe9   :  { %4252 = vst [vmem:[#allocation17_spill] sm:$0xff] %v3863_v3  ;;  %4253 = vst [vmem:[#allocation18_spill] sm:$0xff] %v3866_v4  ;;  %v3868_v42 = vadd.f32 %v188_v9, %v66_v63  ;;  %v3871_v43 = vadd.f32 %v261_v14, %v3831_v60 }
  0xea   :  { %v190_v46 = vpop.f32.mrf.mxu0  ;;  %v263_v47 = vpop.f32.mrf.mxu1 }
  0xeb   :  { %4254 = vst [vmem:[#allocation19_spill] sm:$0xff] %v3868_v42  ;;  %4255 = vst [vmem:[#allocation20_spill] sm:$0xff] %v3871_v43  ;;  %v3873_v50 = vadd.f32 %v190_v46, %v62_v59  ;;  %v3876_v51 = vadd.f32 %v263_v47, %v3825_v55 }
  0xec   :  { %v192_v0 = vpop.f32.mrf.mxu0  ;;  %v265_v61 = vpop.f32.mrf.mxu1 }
  0xed   :  { %4256 = vst [vmem:[#allocation21_spill] sm:$0xff] %v3873_v50  ;;  %4257 = vst [vmem:[#allocation22_spill] sm:$0xff] %v3876_v51  ;;  %v3878_v3 = vadd.f32 %v192_v0, %v66_v63  ;;  %v3881_v62 = vadd.f32 %v265_v61, %v3831_v60 }
  0xee   :  { %v196_v4 = vpop.f32.mrf.mxu0  ;;  %v269_v9 = vpop.f32.mrf.mxu1 }
  0xef   :  { %4258 = vst [vmem:[#allocation23_spill] sm:$0xff] %v3878_v3  ;;  %4259 = vst [vmem:[#allocation24_spill] sm:$0xff] %v3881_v62  ;;  %v3883_v42 = vadd.f32 %v196_v4, %v62_v59  ;;  %v3886_v14 = vadd.f32 %v269_v9, %v3825_v55 }
  0xf0   :  { %v198_v43 = vpop.f32.mrf.mxu0  ;;  %v271_v46 = vpop.f32.mrf.mxu1 }
  0xf1   :  { %4260 = vst [vmem:[#allocation25_spill] sm:$0xff] %v3883_v42  ;;  %4261 = vst [vmem:[#allocation26_spill] sm:$0xff] %v3886_v14  ;;  %v3888_v50 = vadd.f32 %v198_v43, %v66_v63  ;;  %v3891_v47 = vadd.f32 %v271_v46, %v3831_v60  ;;  %v167_v42 = vadd.f32 %v3821_v53, %v62_v59 }
  0xf2   :  { %v200_v51 = vpop.f32.mrf.mxu0  ;;  %v273_v0 = vpop.f32.mrf.mxu1  ;;  %v169_v46 = vadd.f32 %v3827_v57, %v66_v63  ;;  %v240_v57 = vadd.f32 %v3823_v54, %v3825_v55 }
  0xf3   :  { %4262 = vst [vmem:[#allocation27_spill] sm:$0xff] %v3888_v50  ;;  %4263 = vst [vmem:[#allocation28_spill] sm:$0xff] %v3891_v47  ;;  %v3893_v3 = vadd.f32 %v200_v51, %v62_v59  ;;  %v3896_v61 = vadd.f32 %v273_v0, %v3825_v55  ;;  %v242_v59 = vadd.f32 %v3829_v58, %v3831_v60 }
  0xf4   :  { %v202_v62 = vpop.f32.mrf.mxu0  ;;  %v275_v4 = vpop.f32.mrf.mxu1 }
  0xf5   :  { %4264 = vst [vmem:[#allocation29_spill] sm:$0xff] %v3893_v3  ;;  %4265 = vst [vmem:[#allocation30_spill] sm:$0xff] %v3896_v61  ;;  %v3899_v9 = vadd.f32 %v202_v62, %v66_v63  ;;  %v3902_v14 = vadd.f32 %v275_v4, %v3831_v60 }
  0xf6   :  { %v545_v43 = vpop.f32.mrf.mxu0 }
  0xf7   :  { %v593_v47 = vadd.f32 %v545_v43, %v167_v42  ;;  %v586_v50 = vpop.f32.mrf.mxu1 }
  0xf8   :  { %v547_v49 = vpop.f32.mrf.mxu0  ;;  %v595_v4 = vadd.f32 %v586_v50, %v240_v57  ;;  %v4266_v57 = vmov 0  }
  0xf9   :  { %v2961_v51 = vmul.f32 -1.442695, %v593_v47  ;;  %v594_v3 = vadd.f32 %v547_v49, %v169_v46  ;;  %v588_v56 = vpop.f32.mrf.mxu1 }
  0xfa   :  { %v549_v0 = vpop.f32.mrf.mxu0  ;;  %v596_v62 = vadd.f32 %v588_v56, %v242_v59 }
  0xfb   :  { %3382 = vpow2.f32 %v2961_v51  ;;  %v2962_v61 = vmul.f32 -1.442695, %v594_v3  ;;  %v590_v52 = vpop.f32.mrf.mxu1 }
  0xfc   :  { %v550_v48 = vpop.f32.mrf.mxu0  ;;  %v2963_v63 = vmul.f32 -1.442695, %v596_v62 }
  0xfd   :  { %3384 = vpow2.f32 %v2962_v61  ;;  %v591_v53 = vpop.f32.mrf.mxu1  ;;  %v626_v61 = vpop.permute.xlu0 %625 }
  0xfe   :  { %3386 = vpow2.f32 %v2963_v63  ;;  %vm627_vm5 = vcmp.eq.s32.totalorder %v626_v61, 1  ;;  %v3978_v61 = vld [vmem:[#allocation4 + $0xc4] ss:$16 sps:$4 sm:$0xff]  }
  0xff   :  { %vm3510_vm6 = vmpackc.low %vm627_vm5, %vm627_vm5 }
 0x108   :  { %v3383_v42 = vpop.eup %3382 }
 0x109   :  { %v600_v47 = vadd.f32 1.0, %v3383_v42 }
 0x10a   :  { %v3385_v49 = vpop.eup %3384 }
 0x10b   :  { %3388 = vrcp.f32 %v600_v47  ;;  %v606_v43 = vadd.f32 1.0, %v3385_v49  ;;  %v3387_v48 = vpop.eup %3386 }
 0x10c   :  { %3390 = vtanh.f32 %v595_v4  ;;  %v613_v58 = vadd.f32 1.0, %v3387_v48  ;;  %v3972_v48 = vld [vmem:[#allocation4 + $0xe4] ss:$16 sps:$4 sm:$0xff]  }
 0x10d   :  { %3392 = vrcp.f32 %v606_v43  ;;  %v3970_v43 = vld [vmem:[#allocation4 + $0xe0] ss:$16 sps:$4 sm:$0xff]  }
 0x10e   :  { %3394 = vrcp.f32 %v613_v58  ;;  %v3985_v58 = vld [vmem:[#allocation4 + $0xc0] ss:$16 sps:$4 sm:$0xff]  }
 0x118   :  { %v3389_v52 = vpop.eup %3388 }
 0x119   :  { %v3391_v3 = vpop.eup %3390 }
 0x11a   :  { %v3393_v46 = vpop.eup %3392  ;;  %v617_v56 = vmul.f32 %v3391_v3, %v3389_v52  ;;  %v3974_v52 = vld [vmem:[#allocation4 + $0xe8] ss:$16 sps:$4 sm:$0xff]   ;;  %v3976_v3 = vld [vmem:[#allocation4 + $0xec] ss:$16 sps:$4 sm:$0xff]  }
 0x11b   :  { %v616_v60 = vmul.f32 0.0, %v3393_v46  ;;  %v3395_v50 = vpop.eup %3394  ;;  %v3981_v46 = vld [vmem:[#allocation4 + $0xcc] ss:$16 sps:$4 sm:$0xff]  }
 0x11d   :  { %v618_v54 = vadd.f32 %v617_v56, %v616_v60  ;;  %v3989_v60 = vld [vmem:[#allocation4 + $0xc8] ss:$16 sps:$4 sm:$0xff]   ;;  %v3991_v56 = vld [vmem:[#allocation4 + $0xa4] ss:$16 sps:$4 sm:$0xff]  }
 0x11f   :  { %3396 = vtanh.f32 %v618_v54  ;;  %v3909_v55 = vsel %vm627_vm5, %v618_v54, 0.0  ;;  %v3994_v54 = vld [vmem:[#allocation4 + $0xac] ss:$16 sps:$4 sm:$0xff]  }
 0x12c   :  { %v3397_v51 = vpop.eup %3396 }
 0x12d   :  { %v620_v0 = vmul.f32 %v3397_v51, %v3395_v50  ;;  %v4001_v50 = vld [vmem:[#allocation4 + $0xa8] ss:$16 sps:$4 sm:$0xff]   ;;  %v4006_v51 = vld [vmem:[#allocation4 + $0x84] ss:$16 sps:$4 sm:$0xff]  }
 0x12f   :  { %v3911_v53 = vsel %vm627_vm5, %v620_v0, 0.0  ;;  %v3511_v62 = vpack.c.bf16 %v620_v0, %v620_v0  ;;  %v4008_v0 = vld [vmem:[#allocation4 + $0x8c] ss:$16 sps:$4 sm:$0xff]  }
 0x130   :  { %v631_v59 = vpack.c.bf16 %v3911_v53, %v3911_v53 }
 0x131   :  { %3512 = vmatmul.mubr.msk.bf16.vlgmr.msra.gmra.mxu0 %vm3510_vm6, %v3511_v62  ;;  %3515 = vmatmul.mubr.msk.bf16.vlgmr.msra.gmra.mxu1 %vm3510_vm6, %v3511_v62  ;;  %v4018_v62 = vld [vmem:[#allocation4 + $0x64] ss:$16 sps:$4 sm:$0xff]  }
 0x132   :  { %632 = vst [vmem:[#allocation7] sm:$0xf] %v631_v59  ;;  %1152 = vmatpush1.bf16.msra.mxu0 %v3648_v6  ;;  %1193 = vmatpush1.bf16.msra.mxu1 %v3652_v8  ;;  %v1264_v6 = vsel %vm3036_vm7, 1, %v4266_v57  ;;  %v1585_v8 = vsel %vm3072_vm8, 1, %v4266_v57  ;;  %v4012_v59 = vld [vmem:[#allocation4 + $0x88] ss:$16 sps:$4 sm:$0xff]  }
 0x133   :  { %1153 = vmatprep.subr.bf16.mxu0 %v3659_v10  ;;  %1194 = vmatprep.subr.bf16.mxu1 %v3665_v12  ;;  %v2227_v10 = vsel %vm3144_vm9, 1, %v4266_v57 }
 0x134   :  { %1183 = vmatprep.mubr.bf16.mxu0 %v4266_v57  ;;  %1224 = vmatprep.mubr.bf16.mxu1 %v4266_v57 }
 0x135   :  { %1266 = vperm.xlu1 %3227, %v1264_v6   ;;  %v4020_v6 = vld [vmem:[#allocation4 + $0x6c] ss:$16 sps:$4 sm:$0xff]  }
 0x136   :  { %1154 = vmatpush1.bf16.msra.mxu0 %v3663_v11  ;;  %1195 = vmatpush1.bf16.msra.mxu1 %v3669_v13  ;;  %v2869_v11 = vsel %vm3216_vm10, 1, %v4266_v57 }
 0x137   :  { %1155 = vmatprep.subr.bf16.mxu0 %v3677_v15  ;;  %1196 = vmatprep.subr.bf16.mxu1 %v3682_v17 }
 0x139   :  { %1587 = vperm.xlu1 %3227, %v1585_v8   ;;  %v4022_v8 = vld [vmem:[#allocation4 + $0x60] ss:$16 sps:$4 sm:$0xff]  }
 0x13a   :  { %1156 = vmatpush1.bf16.msra.mxu0 %v3680_v16  ;;  %1197 = vmatpush1.bf16.msra.mxu1 %v3686_v18 }
 0x13b   :  { %1157 = vmatprep.subr.bf16.mxu0 %v3688_v19  ;;  %1198 = vmatprep.subr.bf16.mxu1 %v3693_v20 }
 0x13d   :  { %2229 = vperm.xlu1 %3227, %v2227_v10   ;;  %v4024_v10 = vld [vmem:[#allocation4 + $0x68] ss:$16 sps:$4 sm:$0xff]  }
 0x13e   :  { %1158 = vmatpush1.bf16.msra.mxu0 %v3696_v21  ;;  %1199 = vmatpush1.bf16.msra.mxu1 %v3701_v22 }
 0x13f   :  { %1159 = vmatprep.subr.bf16.mxu0 %v3703_v23  ;;  %1200 = vmatprep.subr.bf16.mxu1 %v3707_v24 }
 0x141   :  { %2871 = vperm.xlu1 %3227, %v2869_v11   ;;  %v4030_v11 = vld [vmem:[#allocation4 + $0x44] ss:$16 sps:$4 sm:$0xff]  }
 0x142   :  { %1160 = vmatpush1.bf16.msra.mxu0 %v3713_v26  ;;  %1201 = vmatpush1.bf16.msra.mxu1 %v3717_v27 }
 0x143   :  { %1161 = vmatprep.subr.bf16.mxu0 %v3719_v28  ;;  %1202 = vmatprep.subr.bf16.mxu1 %v3722_v29 }
 0x146   :  { %1162 = vmatpush1.bf16.msra.mxu0 %v3726_v30  ;;  %1203 = vmatpush1.bf16.msra.mxu1 %v3729_v31 }
 0x147   :  { %1163 = vmatprep.subr.bf16.mxu0 %v3734_v32  ;;  %1204 = vmatprep.subr.bf16.mxu1 %v3738_v33 }
 0x14a   :  { %1164 = vmatpush1.bf16.msra.mxu0 %v3743_v35  ;;  %1205 = vmatpush1.bf16.msra.mxu1 %v3746_v36 }
 0x14b   :  { %1165 = vmatprep.subr.bf16.mxu0 %v3755_v38  ;;  %1206 = vmatprep.subr.bf16.mxu1 %v3761_v40 }
 0x14e   :  { %1166 = vmatpush1.bf16.msra.mxu0 %v3759_v39  ;;  %1207 = vmatpush1.bf16.msra.mxu1 %v3765_v41  ;;  %v946_v41 = vpop.permute.xlu0 %945 }
 0x14f   :  { %vm947_vm11 = vcmp.eq.s32.totalorder %v946_v41, 1  ;;  %1472 = vmatprep.subr.bf16.mxu0 %v3972_v48  ;;  %1513 = vmatprep.subr.bf16.mxu1 %v3976_v3 }
 0x1f1   :  { %v864_v12 = vpop.f32.mrf.mxu0  ;;  %v905_v13 = vpop.f32.mrf.mxu1 }
 0x1f2   :  { %v912_v15 = vadd.f32 %v864_v12, %v3833_v1  ;;  %v914_v27 = vadd.f32 %v905_v13, %v3836_v2  ;;  %v4032_v12 = vld [vmem:[#allocation4 + $0x4c] ss:$16 sps:$4 sm:$0xff]   ;;  %v4034_v13 = vld [vmem:[#allocation4 + $0x40] ss:$16 sps:$4 sm:$0xff]  }
 0x1f3   :  { %v866_v16 = vpop.f32.mrf.mxu0  ;;  %v907_v17 = vpop.f32.mrf.mxu1 }
 0x1f4   :  { %v2997_v18 = vmul.f32 -1.442695, %v912_v15  ;;  %v913_v19 = vadd.f32 %v866_v16, %v3838_v5  ;;  %v915_v26 = vadd.f32 %v907_v17, %v3841_v7  ;;  %v4036_v15 = vld [vmem:[#allocation4 + $0x48] ss:$16 sps:$4 sm:$0xff]   ;;  %v4042_v16 = vld [vmem:[#allocation4 + $0x24] ss:$16 sps:$4 sm:$0xff]  }
 0x1f5   :  { %v868_v20 = vpop.f32.mrf.mxu0  ;;  %v909_v21 = vpop.f32.mrf.mxu1  ;;  %v4044_v17 = vld [vmem:[#allocation4 + $0x2c] ss:$16 sps:$4 sm:$0xff]  }
 0x1f6   :  { %3398 = vpow2.f32 %v2997_v18  ;;  %v2998_v22 = vmul.f32 -1.442695, %v913_v19  ;;  %v2999_v28 = vmul.f32 -1.442695, %v915_v26  ;;  %v4046_v18 = vld [vmem:[#allocation4 + $0x20] ss:$16 sps:$4 sm:$0xff]  }
 0x1f7   :  { %v869_v23 = vpop.f32.mrf.mxu0  ;;  %v910_v24 = vpop.f32.mrf.mxu1  ;;  %v4048_v19 = vld [vmem:[#allocation4 + $0x28] ss:$16 sps:$4 sm:$0xff]   ;;  %v4054_v20 = vld [vmem:[#allocation4 + $0x4] ss:$16 sps:$4 sm:$0xff]   ;;  %v4056_v21 = vld [vmem:[#allocation4 + $0xc] ss:$16 sps:$4 sm:$0xff]  }
 0x1f8   :  { %3400 = vpow2.f32 %v2998_v22  ;;  %v4058_v22 = vld [vmem:[#allocation4] ss:$16 sps:$4 sm:$0xff]   ;;  %v4060_v23 = vld [vmem:[#allocation4 + $0x8] ss:$16 sps:$4 sm:$0xff]  }
 0x1f9   :  { %3402 = vtanh.f32 %v914_v27 }
 0x1fa   :  { %3404 = vpow2.f32 %v2999_v28 }
 0x203   :  { %v3399_v29 = vpop.eup %3398 }
 0x204   :  { %v919_v30 = vadd.f32 1.0, %v3399_v29 }
 0x205   :  { %v3401_v31 = vpop.eup %3400 }
 0x206   :  { %3406 = vrcp.f32 %v919_v30  ;;  %v925_v32 = vadd.f32 1.0, %v3401_v31  ;;  %v3403_v33 = vpop.eup %3402 }
 0x207   :  { %v3405_v35 = vpop.eup %3404 }
 0x208   :  { %3408 = vrcp.f32 %v925_v32  ;;  %v932_v39 = vadd.f32 1.0, %v3405_v35 }
 0x20a   :  { %3410 = vrcp.f32 %v932_v39 }
 0x213   :  { %v3407_v36 = vpop.eup %3406 }
 0x214   :  { %v936_v37 = vmul.f32 %v3407_v36, %v3403_v33 }
 0x215   :  { %v3409_v38 = vpop.eup %3408 }
 0x216   :  { %v935_v40 = vmul.f32 %v3409_v38, %v3909_v55 }
 0x217   :  { %v3411_v5 = vpop.eup %3410 }
 0x218   :  { %v937_v1 = vadd.f32 %v936_v37, %v935_v40 }
 0x21a   :  { %3412 = vtanh.f32 %v937_v1  ;;  %v3961_v2 = vsel %vm947_vm11, %v937_v1, %v3909_v55  ;;  %v3997_v55 = vld [vmem:[#allocation4 + $0xa0] ss:$16 sps:$4 sm:$0xff]  }
 0x227   :  { %v3413_v7 = vpop.eup %3412 }
 0x228   :  { %v939_v63 = vmul.f32 %v3413_v7, %v3411_v5 }
 0x22a   :  { %v3964_v42 = vsel %vm947_vm11, %v939_v63, %v3911_v53  ;;  %v950_v4 = vsel %vm947_vm11, %v939_v63, 0.0  ;;  %v4010_v53 = vld [vmem:[#allocation4 + $0x80] ss:$16 sps:$4 sm:$0xff]  }
 0x22b   :  { %v951_v47 = vpack.c.bf16 %v950_v4, %v950_v4  ;;  %v958_v49 = vpack.c.bf16 %v3964_v42, %v3964_v42  ;;  %v1267_v4 = vpop.permute.xlu1 %1266 }
 0x22c   :  { %vm1268_vm12 = vcmp.eq.s32.totalorder %v1267_v4, 1 }
 0x22d   :  { %953 = vst [vmem:[#allocation7 + $0x4] sm:$0xf] %v951_v47  ;;  %1184 = vmatmul.mubr.bf16.vlgmr.msra.gmra.mxu0 %v958_v49  ;;  %1225 = vmatmul.mubr.bf16.vlgmr.msra.gmra.mxu1 %v958_v49 }
 0x22e   :  { %1504 = vmatprep.mubr.bf16.mxu0 %v4266_v57  ;;  %1545 = vmatprep.mubr.bf16.mxu1 %v4266_v57 }
 0x22f   :  { %1473 = vmatpush1.bf16.msra.mxu0 %v3970_v43  ;;  %1514 = vmatpush1.bf16.msra.mxu1 %v3974_v52 }
 0x230   :  { %1474 = vmatprep.subr.bf16.mxu0 %v3978_v61  ;;  %1515 = vmatprep.subr.bf16.mxu1 %v3981_v46 }
 0x233   :  { %1475 = vmatpush1.bf16.msra.mxu0 %v3985_v58  ;;  %1516 = vmatpush1.bf16.msra.mxu1 %v3989_v60 }
 0x234   :  { %1476 = vmatprep.subr.bf16.mxu0 %v3991_v56  ;;  %1517 = vmatprep.subr.bf16.mxu1 %v3994_v54 }
 0x237   :  { %1477 = vmatpush1.bf16.msra.mxu0 %v3997_v55  ;;  %1518 = vmatpush1.bf16.msra.mxu1 %v4001_v50 }
 0x238   :  { %1478 = vmatprep.subr.bf16.mxu0 %v4006_v51  ;;  %1519 = vmatprep.subr.bf16.mxu1 %v4008_v0 }
 0x23b   :  { %1479 = vmatpush1.bf16.msra.mxu0 %v4010_v53  ;;  %1520 = vmatpush1.bf16.msra.mxu1 %v4012_v59 }
 0x23c   :  { %1480 = vmatprep.subr.bf16.mxu0 %v4018_v62  ;;  %1521 = vmatprep.subr.bf16.mxu1 %v4020_v6 }
 0x23f   :  { %1481 = vmatpush1.bf16.msra.mxu0 %v4022_v8  ;;  %1522 = vmatpush1.bf16.msra.mxu1 %v4024_v10 }
 0x240   :  { %1482 = vmatprep.subr.bf16.mxu0 %v4030_v11  ;;  %1523 = vmatprep.subr.bf16.mxu1 %v4032_v12 }
 0x243   :  { %1483 = vmatpush1.bf16.msra.mxu0 %v4034_v13  ;;  %1524 = vmatpush1.bf16.msra.mxu1 %v4036_v15 }
 0x244   :  { %1484 = vmatprep.subr.bf16.mxu0 %v4042_v16  ;;  %1525 = vmatprep.subr.bf16.mxu1 %v4044_v17 }
 0x247   :  { %1485 = vmatpush1.bf16.msra.mxu0 %v4046_v18  ;;  %1526 = vmatpush1.bf16.msra.mxu1 %v4048_v19 }
 0x248   :  { %1486 = vmatprep.subr.bf16.mxu0 %v4054_v20  ;;  %1527 = vmatprep.subr.bf16.mxu1 %v4056_v21 }
 0x24b   :  { %1487 = vmatpush1.bf16.msra.mxu0 %v4058_v22  ;;  %1528 = vmatpush1.bf16.msra.mxu1 %v4060_v23 }
 0x24c   :  { %1793 = vmatprep.subr.bf16.mxu0 %v3972_v48  ;;  %1834 = vmatprep.subr.bf16.mxu1 %v3976_v3 }
 0x2ed   :  { %v1185_v24 = vpop.f32.mrf.mxu0  ;;  %v1226_v26 = vpop.f32.mrf.mxu1 }
 0x2ee   :  { %v1233_v27 = vadd.f32 %v1185_v24, %v3843_v25  ;;  %v1235_v39 = vadd.f32 %v1226_v26, %v3846_v34 }
 0x2ef   :  { %v1187_v28 = vpop.f32.mrf.mxu0  ;;  %v1228_v29 = vpop.f32.mrf.mxu1 }
 0x2f0   :  { %v3033_v30 = vmul.f32 -1.442695, %v1233_v27  ;;  %v1234_v31 = vadd.f32 %v1187_v28, %v3848_v44  ;;  %v1236_v38 = vadd.f32 %v1228_v29, %v3851_v45 }
 0x2f1   :  { %v1189_v32 = vpop.f32.mrf.mxu0  ;;  %v1230_v33 = vpop.f32.mrf.mxu1 }
 0x2f2   :  { %3414 = vpow2.f32 %v3033_v30  ;;  %v3034_v35 = vmul.f32 -1.442695, %v1234_v31  ;;  %v3035_v40 = vmul.f32 -1.442695, %v1236_v38 }
 0x2f3   :  { %v1190_v36 = vpop.f32.mrf.mxu0  ;;  %v1231_v37 = vpop.f32.mrf.mxu1 }
 0x2f4   :  { %3416 = vpow2.f32 %v3034_v35  ;;  %v4267_v35 = vld [vmem:[#allocation13_spill] sm:$0xff] }
 0x2f5   :  { %3418 = vtanh.f32 %v1235_v39 }
 0x2f6   :  { %3420 = vpow2.f32 %v3035_v40  ;;  %v4268_v40 = vld [vmem:[#allocation15_spill] sm:$0xff] }
 0x2ff   :  { %v3415_v41 = vpop.eup %3414 }
 0x300   :  { %v1240_v1 = vadd.f32 1.0, %v3415_v41 }
 0x301   :  { %v3417_v25 = vpop.eup %3416 }
 0x302   :  { %3422 = vrcp.f32 %v1240_v1  ;;  %v1246_v5 = vadd.f32 1.0, %v3417_v25  ;;  %v3419_v44 = vpop.eup %3418 }
 0x303   :  { %v3421_v7 = vpop.eup %3420 }
 0x304   :  { %3424 = vrcp.f32 %v1246_v5  ;;  %v1253_v24 = vadd.f32 1.0, %v3421_v7 }
 0x306   :  { %3426 = vrcp.f32 %v1253_v24 }
 0x30f   :  { %v3423_v63 = vpop.eup %3422 }
 0x310   :  { %v1257_v47 = vmul.f32 %v3423_v63, %v3419_v44  ;;  %v4269_v63 = vld [vmem:[#allocation16_spill] sm:$0xff] }
 0x311   :  { %v3425_v49 = vpop.eup %3424 }
 0x312   :  { %v1256_v45 = vmul.f32 %v3425_v49, %v3961_v2 }
 0x313   :  { %v3427_v27 = vpop.eup %3426 }
 0x314   :  { %v1258_v34 = vadd.f32 %v1257_v47, %v1256_v45  ;;  %v4270_v47 = vld [vmem:[#allocation14_spill] sm:$0xff] }
 0x316   :  { %3428 = vtanh.f32 %v1258_v34  ;;  %v4074_v26 = vsel %vm1268_vm12, %v1258_v34, %v3961_v2 }
 0x323   :  { %v3429_v28 = vpop.eup %3428 }
 0x324   :  { %v1260_v29 = vmul.f32 %v3429_v28, %v3427_v27 }
 0x326   :  { %v4077_v30 = vsel %vm1268_vm12, %v1260_v29, %v3964_v42  ;;  %v1271_v31 = vsel %vm1268_vm12, %v1260_v29, 0.0 }
 0x327   :  { %v1272_v32 = vpack.c.bf16 %v1271_v31, %v1271_v31  ;;  %v1279_v33 = vpack.c.bf16 %v4077_v30, %v4077_v30 }
 0x329   :  { %1274 = vst [vmem:[#allocation7 + $0x8] sm:$0xf] %v1272_v32  ;;  %1505 = vmatmul.mubr.bf16.vlgmr.msra.gmra.mxu0 %v1279_v33  ;;  %1546 = vmatmul.mubr.bf16.vlgmr.msra.gmra.mxu1 %v1279_v33 }
 0x32a   :  { %1794 = vmatpush1.bf16.msra.mxu0 %v3970_v43  ;;  %1835 = vmatpush1.bf16.msra.mxu1 %v3974_v52 }
 0x32b   :  { %1795 = vmatprep.subr.bf16.mxu0 %v3978_v61  ;;  %1836 = vmatprep.subr.bf16.mxu1 %v3981_v46 }
 0x32c   :  { %1825 = vmatprep.mubr.bf16.mxu0 %v4266_v57  ;;  %1866 = vmatprep.mubr.bf16.mxu1 %v4266_v57 }
 0x32e   :  { %1796 = vmatpush1.bf16.msra.mxu0 %v3985_v58  ;;  %1837 = vmatpush1.bf16.msra.mxu1 %v3989_v60 }
 0x32f   :  { %1797 = vmatprep.subr.bf16.mxu0 %v3991_v56  ;;  %1838 = vmatprep.subr.bf16.mxu1 %v3994_v54 }
 0x332   :  { %1798 = vmatpush1.bf16.msra.mxu0 %v3997_v55  ;;  %1839 = vmatpush1.bf16.msra.mxu1 %v4001_v50 }
 0x333   :  { %1799 = vmatprep.subr.bf16.mxu0 %v4006_v51  ;;  %1840 = vmatprep.subr.bf16.mxu1 %v4008_v0 }
 0x336   :  { %1800 = vmatpush1.bf16.msra.mxu0 %v4010_v53  ;;  %1841 = vmatpush1.bf16.msra.mxu1 %v4012_v59 }
 0x337   :  { %1801 = vmatprep.subr.bf16.mxu0 %v4018_v62  ;;  %1842 = vmatprep.subr.bf16.mxu1 %v4020_v6 }
 0x33a   :  { %1802 = vmatpush1.bf16.msra.mxu0 %v4022_v8  ;;  %1843 = vmatpush1.bf16.msra.mxu1 %v4024_v10 }
 0x33b   :  { %1803 = vmatprep.subr.bf16.mxu0 %v4030_v11  ;;  %1844 = vmatprep.subr.bf16.mxu1 %v4032_v12 }
 0x33e   :  { %1804 = vmatpush1.bf16.msra.mxu0 %v4034_v13  ;;  %1845 = vmatpush1.bf16.msra.mxu1 %v4036_v15 }
 0x33f   :  { %1805 = vmatprep.subr.bf16.mxu0 %v4042_v16  ;;  %1846 = vmatprep.subr.bf16.mxu1 %v4044_v17 }
 0x342   :  { %1806 = vmatpush1.bf16.msra.mxu0 %v4046_v18  ;;  %1847 = vmatpush1.bf16.msra.mxu1 %v4048_v19 }
 0x343   :  { %1807 = vmatprep.subr.bf16.mxu0 %v4054_v20  ;;  %1848 = vmatprep.subr.bf16.mxu1 %v4056_v21 }
 0x346   :  { %1808 = vmatpush1.bf16.msra.mxu0 %v4058_v22  ;;  %1849 = vmatpush1.bf16.msra.mxu1 %v4060_v23 }
 0x347   :  { %2114 = vmatprep.subr.bf16.mxu0 %v3972_v48  ;;  %2155 = vmatprep.subr.bf16.mxu1 %v3976_v3 }
 0x3e9   :  { %v1506_v2 = vpop.f32.mrf.mxu0  ;;  %v1547_v42 = vpop.f32.mrf.mxu1 }
 0x3ea   :  { %v1554_v36 = vadd.f32 %v1506_v2, %v4267_v35  ;;  %v1556_v49 = vadd.f32 %v1547_v42, %v4270_v47 }
 0x3eb   :  { %v1508_v37 = vpop.f32.mrf.mxu0  ;;  %v1549_v38 = vpop.f32.mrf.mxu1 }
 0x3ec   :  { %v3069_v39 = vmul.f32 -1.442695, %v1554_v36  ;;  %v1555_v41 = vadd.f32 %v1508_v37, %v4268_v40  ;;  %v1557_v4 = vadd.f32 %v1549_v38, %v4269_v63  ;;  %v1588_v37 = vpop.permute.xlu1 %1587 }
 0x3ed   :  { %v1510_v1 = vpop.f32.mrf.mxu0  ;;  %v1551_v25 = vpop.f32.mrf.mxu1  ;;  %vm1589_vm13 = vcmp.eq.s32.totalorder %v1588_v37, 1 }
 0x3ee   :  { %3430 = vpow2.f32 %v3069_v39  ;;  %v3070_v5 = vmul.f32 -1.442695, %v1555_v41  ;;  %v3071_v24 = vmul.f32 -1.442695, %v1557_v4 }
 0x3ef   :  { %v1511_v44 = vpop.f32.mrf.mxu0  ;;  %v1552_v7 = vpop.f32.mrf.mxu1 }
 0x3f0   :  { %3432 = vpow2.f32 %v3070_v5  ;;  %v4271_v7 = vld [vmem:[#allocation17_spill] sm:$0xff] }
 0x3f1   :  { %3434 = vtanh.f32 %v1556_v49 }
 0x3f2   :  { %3436 = vpow2.f32 %v3071_v24  ;;  %v4272_v24 = vld [vmem:[#allocation19_spill] sm:$0xff] }
 0x3fb   :  { %v3431_v45 = vpop.eup %3430 }
 0x3fc   :  { %v1561_v34 = vadd.f32 1.0, %v3431_v45 }
 0x3fd   :  { %v3433_v27 = vpop.eup %3432 }
 0x3fe   :  { %3438 = vrcp.f32 %v1561_v34  ;;  %v1567_v28 = vadd.f32 1.0, %v3433_v27  ;;  %v3435_v29 = vpop.eup %3434 }
 0x3ff   :  { %v3437_v31 = vpop.eup %3436 }
 0x400   :  { %3440 = vrcp.f32 %v1567_v28  ;;  %v1574_v35 = vadd.f32 1.0, %v3437_v31 }
 0x402   :  { %3442 = vrcp.f32 %v1574_v35 }
 0x40b   :  { %v3439_v32 = vpop.eup %3438 }
 0x40c   :  { %v1578_v33 = vmul.f32 %v3439_v32, %v3435_v29  ;;  %v4273_v32 = vld [vmem:[#allocation20_spill] sm:$0xff] }
 0x40d   :  { %v3441_v2 = vpop.eup %3440 }
 0x40e   :  { %v1577_v36 = vmul.f32 %v3441_v2, %v4074_v26 }
 0x40f   :  { %v3443_v39 = vpop.eup %3442 }
 0x410   :  { %v1579_v38 = vadd.f32 %v1578_v33, %v1577_v36  ;;  %v4274_v33 = vld [vmem:[#allocation18_spill] sm:$0xff] }
 0x412   :  { %3444 = vtanh.f32 %v1579_v38  ;;  %v4121_v42 = vsel %vm1589_vm13, %v1579_v38, %v4074_v26 }
 0x41f   :  { %v3445_v40 = vpop.eup %3444 }
 0x420   :  { %v1581_v41 = vmul.f32 %v3445_v40, %v3443_v39 }
 0x422   :  { %v4124_v1 = vsel %vm1589_vm13, %v1581_v41, %v4077_v30  ;;  %v1592_v25 = vsel %vm1589_vm13, %v1581_v41, 0.0 }
 0x423   :  { %v1593_v5 = vpack.c.bf16 %v1592_v25, %v1592_v25  ;;  %v1600_v44 = vpack.c.bf16 %v4124_v1, %v4124_v1 }
 0x425   :  { %1595 = vst [vmem:[#allocation7 + $0xc] sm:$0xf] %v1593_v5  ;;  %1826 = vmatmul.mubr.bf16.vlgmr.msra.gmra.mxu0 %v1600_v44  ;;  %1867 = vmatmul.mubr.bf16.vlgmr.msra.gmra.mxu1 %v1600_v44 }
 0x426   :  { %2115 = vmatpush1.bf16.msra.mxu0 %v3970_v43  ;;  %2156 = vmatpush1.bf16.msra.mxu1 %v3974_v52 }
 0x427   :  { %2116 = vmatprep.subr.bf16.mxu0 %v3978_v61  ;;  %2157 = vmatprep.subr.bf16.mxu1 %v3981_v46 }
 0x428   :  { %2146 = vmatprep.mubr.bf16.mxu0 %v4266_v57  ;;  %2187 = vmatprep.mubr.bf16.mxu1 %v4266_v57 }
 0x42a   :  { %2117 = vmatpush1.bf16.msra.mxu0 %v3985_v58  ;;  %2158 = vmatpush1.bf16.msra.mxu1 %v3989_v60 }
 0x42b   :  { %2118 = vmatprep.subr.bf16.mxu0 %v3991_v56  ;;  %2159 = vmatprep.subr.bf16.mxu1 %v3994_v54 }
 0x42e   :  { %2119 = vmatpush1.bf16.msra.mxu0 %v3997_v55  ;;  %2160 = vmatpush1.bf16.msra.mxu1 %v4001_v50 }
 0x42f   :  { %2120 = vmatprep.subr.bf16.mxu0 %v4006_v51  ;;  %2161 = vmatprep.subr.bf16.mxu1 %v4008_v0 }
 0x432   :  { %2121 = vmatpush1.bf16.msra.mxu0 %v4010_v53  ;;  %2162 = vmatpush1.bf16.msra.mxu1 %v4012_v59 }
 0x433   :  { %2122 = vmatprep.subr.bf16.mxu0 %v4018_v62  ;;  %2163 = vmatprep.subr.bf16.mxu1 %v4020_v6 }
 0x436   :  { %2123 = vmatpush1.bf16.msra.mxu0 %v4022_v8  ;;  %2164 = vmatpush1.bf16.msra.mxu1 %v4024_v10 }
 0x437   :  { %2124 = vmatprep.subr.bf16.mxu0 %v4030_v11  ;;  %2165 = vmatprep.subr.bf16.mxu1 %v4032_v12 }
 0x43a   :  { %2125 = vmatpush1.bf16.msra.mxu0 %v4034_v13  ;;  %2166 = vmatpush1.bf16.msra.mxu1 %v4036_v15 }
 0x43b   :  { %2126 = vmatprep.subr.bf16.mxu0 %v4042_v16  ;;  %2167 = vmatprep.subr.bf16.mxu1 %v4044_v17 }
 0x43e   :  { %2127 = vmatpush1.bf16.msra.mxu0 %v4046_v18  ;;  %2168 = vmatpush1.bf16.msra.mxu1 %v4048_v19 }
 0x43f   :  { %2128 = vmatprep.subr.bf16.mxu0 %v4054_v20  ;;  %2169 = vmatprep.subr.bf16.mxu1 %v4056_v21 }
 0x442   :  { %2129 = vmatpush1.bf16.msra.mxu0 %v4058_v22  ;;  %2170 = vmatpush1.bf16.msra.mxu1 %v4060_v23 }
 0x443   :  { %2435 = vmatprep.subr.bf16.mxu0 %v3972_v48  ;;  %2476 = vmatprep.subr.bf16.mxu1 %v3976_v3 }
 0x4e5   :  { %v1827_v26 = vpop.f32.mrf.mxu0  ;;  %v1868_v30 = vpop.f32.mrf.mxu1 }
 0x4e6   :  { %v1875_v63 = vadd.f32 %v1827_v26, %v4271_v7  ;;  %v1877_v3 = vadd.f32 %v1868_v30, %v4274_v33  ;;  %v1909_v7 = vpop.permute.xlu0 %1908 }
 0x4e7   :  { %v1829_v4 = vpop.f32.mrf.mxu0  ;;  %v1870_v47 = vpop.f32.mrf.mxu1  ;;  %vm1910_vm14 = vcmp.eq.s32.totalorder %v1909_v7, 1  ;;  %v3354_v7 = vld [vmem:[#allocation4 + $0x84] ss:$16 sps:$4 sm:$0xff]  }
 0x4e8   :  { %v3105_v49 = vmul.f32 -1.442695, %v1875_v63  ;;  %v1876_v45 = vadd.f32 %v1829_v4, %v4272_v24  ;;  %v1878_v48 = vadd.f32 %v1870_v47, %v4273_v32 }
 0x4e9   :  { %v1831_v34 = vpop.f32.mrf.mxu0  ;;  %v1872_v27 = vpop.f32.mrf.mxu1 }
 0x4ea   :  { %3446 = vpow2.f32 %v3105_v49  ;;  %v3106_v28 = vmul.f32 -1.442695, %v1876_v45  ;;  %v3107_v2 = vmul.f32 -1.442695, %v1878_v48 }
 0x4eb   :  { %v1832_v29 = vpop.f32.mrf.mxu0  ;;  %v1873_v31 = vpop.f32.mrf.mxu1 }
 0x4ec   :  { %3448 = vpow2.f32 %v3106_v28 }
 0x4ed   :  { %3450 = vtanh.f32 %v1877_v3 }
 0x4ee   :  { %3452 = vpow2.f32 %v3107_v2 }
 0x4f7   :  { %v3447_v35 = vpop.eup %3446 }
 0x4f8   :  { %v1882_v36 = vadd.f32 1.0, %v3447_v35  ;;  %v3336_v35 = vld [vmem:[#allocation4 + $0xe4] ss:$16 sps:$4 sm:$0xff]  }
 0x4f9   :  { %v3449_v37 = vpop.eup %3448 }
 0x4fa   :  { %3454 = vrcp.f32 %v1882_v36  ;;  %v1888_v38 = vadd.f32 1.0, %v3449_v37  ;;  %v3451_v39 = vpop.eup %3450  ;;  %v3339_v36 = vld [vmem:[#allocation4 + $0xec] ss:$16 sps:$4 sm:$0xff]   ;;  %v3334_v37 = vld [vmem:[#allocation4 + $0xe0] ss:$16 sps:$4 sm:$0xff]  }
 0x4fb   :  { %v3453_v40 = vpop.eup %3452 }
 0x4fc   :  { %3456 = vrcp.f32 %v1888_v38  ;;  %v1895_v44 = vadd.f32 1.0, %v3453_v40  ;;  %v3337_v38 = vld [vmem:[#allocation4 + $0xe8] ss:$16 sps:$4 sm:$0xff]   ;;  %v3345_v40 = vld [vmem:[#allocation4 + $0xcc] ss:$16 sps:$4 sm:$0xff]  }
 0x4fe   :  { %3458 = vrcp.f32 %v1895_v44  ;;  %v3351_v44 = vld [vmem:[#allocation4 + $0xac] ss:$16 sps:$4 sm:$0xff]  }
 0x507   :  { %v3455_v41 = vpop.eup %3454 }
 0x508   :  { %v1899_v25 = vmul.f32 %v3455_v41, %v3451_v39  ;;  %v3342_v39 = vld [vmem:[#allocation4 + $0xc4] ss:$16 sps:$4 sm:$0xff]   ;;  %v3340_v41 = vld [vmem:[#allocation4 + $0xc0] ss:$16 sps:$4 sm:$0xff]  }
 0x509   :  { %v3457_v5 = vpop.eup %3456 }
 0x50a   :  { %v1898_v26 = vmul.f32 %v3457_v5, %v4121_v42  ;;  %v3348_v5 = vld [vmem:[#allocation4 + $0xa4] ss:$16 sps:$4 sm:$0xff]  }
 0x50b   :  { %v3459_v4 = vpop.eup %3458 }
 0x50c   :  { %v1900_v63 = vadd.f32 %v1899_v25, %v1898_v26  ;;  %v3343_v25 = vld [vmem:[#allocation4 + $0xc8] ss:$16 sps:$4 sm:$0xff]   ;;  %v3346_v26 = vld [vmem:[#allocation4 + $0xa0] ss:$16 sps:$4 sm:$0xff]  }
 0x50e   :  { %3460 = vtanh.f32 %v1900_v63  ;;  %v4168_v30 = vsel %vm1910_vm14, %v1900_v63, %v4121_v42  ;;  %v2230_v42 = vpop.permute.xlu1 %2229  ;;  %v3357_v63 = vld [vmem:[#allocation4 + $0x8c] ss:$16 sps:$4 sm:$0xff]  }
 0x50f   :  { %vm2231_vm15 = vcmp.eq.s32.totalorder %v2230_v42, 1 }
 0x51b   :  { %v3461_v47 = vpop.eup %3460 }
 0x51c   :  { %v1902_v49 = vmul.f32 %v3461_v47, %v3459_v4  ;;  %v3355_v4 = vld [vmem:[#allocation4 + $0x88] ss:$16 sps:$4 sm:$0xff]   ;;  %v3360_v47 = vld [vmem:[#allocation4 + $0x64] ss:$16 sps:$4 sm:$0xff]  }
 0x51e   :  { %v4171_v24 = vsel %vm1910_vm14, %v1902_v49, %v4124_v1  ;;  %v1913_v45 = vsel %vm1910_vm14, %v1902_v49, 0.0  ;;  %v3358_v49 = vld [vmem:[#allocation4 + $0x60] ss:$16 sps:$4 sm:$0xff]  }
 0x51f   :  { %v1914_v34 = vpack.c.bf16 %v1913_v45, %v1913_v45  ;;  %v1921_v27 = vpack.c.bf16 %v4171_v24, %v4171_v24  ;;  %v3363_v45 = vld [vmem:[#allocation4 + $0x6c] ss:$16 sps:$4 sm:$0xff]  }
 0x521   :  { %1916 = vst [vmem:[#allocation7 + $0x10] sm:$0xf] %v1914_v34  ;;  %2147 = vmatmul.mubr.bf16.vlgmr.msra.gmra.mxu0 %v1921_v27  ;;  %2188 = vmatmul.mubr.bf16.vlgmr.msra.gmra.mxu1 %v1921_v27  ;;  %v3366_v34 = vld [vmem:[#allocation4 + $0x44] ss:$16 sps:$4 sm:$0xff]   ;;  %v3369_v27 = vld [vmem:[#allocation4 + $0x4c] ss:$16 sps:$4 sm:$0xff]  }
 0x522   :  { %2436 = vmatpush1.bf16.msra.mxu0 %v3970_v43  ;;  %2477 = vmatpush1.bf16.msra.mxu1 %v3974_v52 }
 0x523   :  { %2437 = vmatprep.subr.bf16.mxu0 %v3978_v61  ;;  %2478 = vmatprep.subr.bf16.mxu1 %v3981_v46  ;;  %v4275_v61 = vld [vmem:[#allocation21_spill] sm:$0xff] }
 0x524   :  { %2467 = vmatprep.mubr.bf16.mxu0 %v4266_v57  ;;  %2508 = vmatprep.mubr.bf16.mxu1 %v4266_v57 }
 0x526   :  { %2438 = vmatpush1.bf16.msra.mxu0 %v3985_v58  ;;  %2479 = vmatpush1.bf16.msra.mxu1 %v3989_v60 }
 0x527   :  { %2439 = vmatprep.subr.bf16.mxu0 %v3991_v56  ;;  %2480 = vmatprep.subr.bf16.mxu1 %v3994_v54  ;;  %v4276_v54 = vld [vmem:[#allocation23_spill] sm:$0xff] }
 0x52a   :  { %2440 = vmatpush1.bf16.msra.mxu0 %v3997_v55  ;;  %2481 = vmatpush1.bf16.msra.mxu1 %v4001_v50 }
 0x52b   :  { %2441 = vmatprep.subr.bf16.mxu0 %v4006_v51  ;;  %2482 = vmatprep.subr.bf16.mxu1 %v4008_v0 }
 0x52e   :  { %2442 = vmatpush1.bf16.msra.mxu0 %v4010_v53  ;;  %2483 = vmatpush1.bf16.msra.mxu1 %v4012_v59 }
 0x52f   :  { %2443 = vmatprep.subr.bf16.mxu0 %v4018_v62  ;;  %2484 = vmatprep.subr.bf16.mxu1 %v4020_v6  ;;  %v4277_v62 = vld [vmem:[#allocation24_spill] sm:$0xff] }
 0x532   :  { %2444 = vmatpush1.bf16.msra.mxu0 %v4022_v8  ;;  %2485 = vmatpush1.bf16.msra.mxu1 %v4024_v10  ;;  %v4278_v8 = vld [vmem:[#allocation22_spill] sm:$0xff] }
 0x533   :  { %2445 = vmatprep.subr.bf16.mxu0 %v4030_v11  ;;  %2486 = vmatprep.subr.bf16.mxu1 %v4032_v12 }
 0x536   :  { %2446 = vmatpush1.bf16.msra.mxu0 %v4034_v13  ;;  %2487 = vmatpush1.bf16.msra.mxu1 %v4036_v15 }
 0x537   :  { %2447 = vmatprep.subr.bf16.mxu0 %v4042_v16  ;;  %2488 = vmatprep.subr.bf16.mxu1 %v4044_v17 }
 0x53a   :  { %2448 = vmatpush1.bf16.msra.mxu0 %v4046_v18  ;;  %2489 = vmatpush1.bf16.msra.mxu1 %v4048_v19 }
 0x53b   :  { %2449 = vmatprep.subr.bf16.mxu0 %v4054_v20  ;;  %2490 = vmatprep.subr.bf16.mxu1 %v4056_v21 }
 0x53e   :  { %2450 = vmatpush1.bf16.msra.mxu0 %v4058_v22  ;;  %2491 = vmatpush1.bf16.msra.mxu1 %v4060_v23 }
 0x53f   :  { %2756 = vmatprep.subr.bf16.mxu0 %v3336_v35  ;;  %2797 = vmatprep.subr.bf16.mxu1 %v3339_v36  ;;  %v2551_v36 = vpop.permute.xlu0 %2550 }
 0x540   :  { %vm2552_vm0 = vcmp.eq.s32.totalorder %v2551_v36, 1 }
 0x5e1   :  { %v2148_v43 = vpop.f32.mrf.mxu0  ;;  %v2189_v52 = vpop.f32.mrf.mxu1 }
 0x5e2   :  { %v2196_v46 = vadd.f32 %v2148_v43, %v4275_v61  ;;  %v2198_v10 = vadd.f32 %v2189_v52, %v4278_v8  ;;  %v3364_v43 = vld [vmem:[#allocation4 + $0x40] ss:$16 sps:$4 sm:$0xff]   ;;  %v3367_v52 = vld [vmem:[#allocation4 + $0x48] ss:$16 sps:$4 sm:$0xff]   ;;  %v3372_v61 = vld [vmem:[#allocation4 + $0x24] ss:$16 sps:$4 sm:$0xff]  }
 0x5e3   :  { %v2150_v58 = vpop.f32.mrf.mxu0  ;;  %v2191_v60 = vpop.f32.mrf.mxu1 }
 0x5e4   :  { %v3141_v56 = vmul.f32 -1.442695, %v2196_v46  ;;  %v2197_v55 = vadd.f32 %v2150_v58, %v4276_v54  ;;  %v2199_v6 = vadd.f32 %v2191_v60, %v4277_v62  ;;  %v3375_v46 = vld [vmem:[#allocation4 + $0x2c] ss:$16 sps:$4 sm:$0xff]   ;;  %v3370_v58 = vld [vmem:[#allocation4 + $0x20] ss:$16 sps:$4 sm:$0xff]  }
 0x5e5   :  { %v2152_v50 = vpop.f32.mrf.mxu0  ;;  %v2193_v51 = vpop.f32.mrf.mxu1  ;;  %v3373_v60 = vld [vmem:[#allocation4 + $0x28] ss:$16 sps:$4 sm:$0xff]   ;;  %v3381_v54 = vld [vmem:[#allocation4 + $0xc] ss:$16 sps:$4 sm:$0xff]  }
 0x5e6   :  { %3462 = vpow2.f32 %v3141_v56  ;;  %v3142_v0 = vmul.f32 -1.442695, %v2197_v55  ;;  %v3143_v11 = vmul.f32 -1.442695, %v2199_v6  ;;  %v3378_v56 = vld [vmem:[#allocation4 + $0x4] ss:$16 sps:$4 sm:$0xff]  }
 0x5e7   :  { %v2153_v53 = vpop.f32.mrf.mxu0  ;;  %v2194_v59 = vpop.f32.mrf.mxu1  ;;  %v3376_v55 = vld [vmem:[#allocation4] ss:$16 sps:$4 sm:$0xff]   ;;  %v3379_v50 = vld [vmem:[#allocation4 + $0x8] ss:$16 sps:$4 sm:$0xff]  }
 0x5e8   :  { %3464 = vpow2.f32 %v3142_v0  ;;  %v4279_v53 = vld [vmem:[#allocation25_spill] sm:$0xff] }
 0x5e9   :  { %3466 = vtanh.f32 %v2198_v10  ;;  %v4280_v10 = vld [vmem:[#allocation27_spill] sm:$0xff] }
 0x5ea   :  { %3468 = vpow2.f32 %v3143_v11 }
 0x5f3   :  { %v3463_v12 = vpop.eup %3462 }
 0x5f4   :  { %v2203_v13 = vadd.f32 1.0, %v3463_v12 }
 0x5f5   :  { %v3465_v15 = vpop.eup %3464 }
 0x5f6   :  { %3470 = vrcp.f32 %v2203_v13  ;;  %v2209_v16 = vadd.f32 1.0, %v3465_v15  ;;  %v3467_v17 = vpop.eup %3466 }
 0x5f7   :  { %v3469_v18 = vpop.eup %3468 }
 0x5f8   :  { %3472 = vrcp.f32 %v2209_v16  ;;  %v2216_v22 = vadd.f32 1.0, %v3469_v18  ;;  %v4281_v18 = vld [vmem:[#allocation28_spill] sm:$0xff] }
 0x5fa   :  { %3474 = vrcp.f32 %v2216_v22 }
 0x603   :  { %v3471_v19 = vpop.eup %3470 }
 0x604   :  { %v2220_v20 = vmul.f32 %v3471_v19, %v3467_v17 }
 0x605   :  { %v3473_v21 = vpop.eup %3472 }
 0x606   :  { %v2219_v23 = vmul.f32 %v3473_v21, %v4168_v30 }
 0x607   :  { %v3475_v29 = vpop.eup %3474 }
 0x608   :  { %v2221_v1 = vadd.f32 %v2220_v20, %v2219_v23  ;;  %v4282_v20 = vld [vmem:[#allocation26_spill] sm:$0xff] }
 0x60a   :  { %3476 = vtanh.f32 %v2221_v1  ;;  %v4213_v28 = vsel %vm2231_vm15, %v2221_v1, %v4168_v30  ;;  %v3352_v30 = vld [vmem:[#allocation4 + $0x80] ss:$16 sps:$4 sm:$0xff]  }
 0x617   :  { %v3477_v31 = vpop.eup %3476 }
 0x618   :  { %v2223_v32 = vmul.f32 %v3477_v31, %v3475_v29 }
 0x61a   :  { %v4216_v48 = vsel %vm2231_vm15, %v2223_v32, %v4171_v24  ;;  %v2234_v33 = vsel %vm2231_vm15, %v2223_v32, 0.0  ;;  %v3361_v24 = vld [vmem:[#allocation4 + $0x68] ss:$16 sps:$4 sm:$0xff]  }
 0x61b   :  { %v2235_v3 = vpack.c.bf16 %v2234_v33, %v2234_v33  ;;  %v2242_v2 = vpack.c.bf16 %v4216_v48, %v4216_v48 }
 0x61d   :  { %2237 = vst [vmem:[#allocation7 + $0x14] sm:$0xf] %v2235_v3  ;;  %2468 = vmatmul.mubr.bf16.vlgmr.msra.gmra.mxu0 %v2242_v2  ;;  %2509 = vmatmul.mubr.bf16.vlgmr.msra.gmra.mxu1 %v2242_v2 }
 0x61e   :  { %2788 = vmatprep.mubr.bf16.mxu0 %v4266_v57  ;;  %2829 = vmatprep.mubr.bf16.mxu1 %v4266_v57  ;;  %v3349_v57 = vld [vmem:[#allocation4 + $0xa8] ss:$16 sps:$4 sm:$0xff]  }
 0x61f   :  { %2757 = vmatpush1.bf16.msra.mxu0 %v3334_v37  ;;  %2798 = vmatpush1.bf16.msra.mxu1 %v3337_v38 }
 0x620   :  { %2758 = vmatprep.subr.bf16.mxu0 %v3342_v39  ;;  %2799 = vmatprep.subr.bf16.mxu1 %v3345_v40 }
 0x623   :  { %2759 = vmatpush1.bf16.msra.mxu0 %v3340_v41  ;;  %2800 = vmatpush1.bf16.msra.mxu1 %v3343_v25 }
 0x624   :  { %2760 = vmatprep.subr.bf16.mxu0 %v3348_v5  ;;  %2801 = vmatprep.subr.bf16.mxu1 %v3351_v44 }
 0x627   :  { %2761 = vmatpush1.bf16.msra.mxu0 %v3346_v26  ;;  %2802 = vmatpush1.bf16.msra.mxu1 %v3349_v57 }
 0x628   :  { %2762 = vmatprep.subr.bf16.mxu0 %v3354_v7  ;;  %2803 = vmatprep.subr.bf16.mxu1 %v3357_v63 }
 0x62b   :  { %2763 = vmatpush1.bf16.msra.mxu0 %v3352_v30  ;;  %2804 = vmatpush1.bf16.msra.mxu1 %v3355_v4  ;;  %v4283_v30 = vld [vmem:[#allocation29_spill] sm:$0xff] }
 0x62c   :  { %2764 = vmatprep.subr.bf16.mxu0 %v3360_v47  ;;  %2805 = vmatprep.subr.bf16.mxu1 %v3363_v45 }
 0x62f   :  { %2765 = vmatpush1.bf16.msra.mxu0 %v3358_v49  ;;  %2806 = vmatpush1.bf16.msra.mxu1 %v3361_v24 }
 0x630   :  { %2766 = vmatprep.subr.bf16.mxu0 %v3366_v34  ;;  %2807 = vmatprep.subr.bf16.mxu1 %v3369_v27 }
 0x633   :  { %2767 = vmatpush1.bf16.msra.mxu0 %v3364_v43  ;;  %2808 = vmatpush1.bf16.msra.mxu1 %v3367_v52 }
 0x634   :  { %2768 = vmatprep.subr.bf16.mxu0 %v3372_v61  ;;  %2809 = vmatprep.subr.bf16.mxu1 %v3375_v46  ;;  %v4284_v61 = vld [vmem:[#allocation30_spill] sm:$0xff] }
 0x637   :  { %2769 = vmatpush1.bf16.msra.mxu0 %v3370_v58  ;;  %2810 = vmatpush1.bf16.msra.mxu1 %v3373_v60 }
 0x638   :  { %2770 = vmatprep.subr.bf16.mxu0 %v3378_v56  ;;  %2811 = vmatprep.subr.bf16.mxu1 %v3381_v54 }
 0x63b   :  { %2771 = vmatpush1.bf16.msra.mxu0 %v3376_v55  ;;  %2812 = vmatpush1.bf16.msra.mxu1 %v3379_v50 }
 0x6dd   :  { %v2469_v51 = vpop.f32.mrf.mxu0  ;;  %v2510_v0 = vpop.f32.mrf.mxu1 }
 0x6de   :  { %v2517_v59 = vadd.f32 %v2469_v51, %v4279_v53  ;;  %v2519_v21 = vadd.f32 %v2510_v0, %v4282_v20 }
 0x6df   :  { %v2471_v62 = vpop.f32.mrf.mxu0  ;;  %v2512_v6 = vpop.f32.mrf.mxu1 }
 0x6e0   :  { %v3177_v8 = vmul.f32 -1.442695, %v2517_v59  ;;  %v2518_v11 = vadd.f32 %v2471_v62, %v4280_v10  ;;  %v2520_v19 = vadd.f32 %v2512_v6, %v4281_v18 }
 0x6e1   :  { %v2473_v12 = vpop.f32.mrf.mxu0  ;;  %v2514_v13 = vpop.f32.mrf.mxu1 }
 0x6e2   :  { %3478 = vpow2.f32 %v3177_v8  ;;  %v3178_v15 = vmul.f32 -1.442695, %v2518_v11  ;;  %v3179_v22 = vmul.f32 -1.442695, %v2520_v19  ;;  %v2872_v8 = vpop.permute.xlu1 %2871 }
 0x6e3   :  { %v2474_v16 = vpop.f32.mrf.mxu0  ;;  %v2515_v17 = vpop.f32.mrf.mxu1  ;;  %vm2873_vm1 = vcmp.eq.s32.totalorder %v2872_v8, 1 }
 0x6e4   :  { %3480 = vpow2.f32 %v3178_v15 }
 0x6e5   :  { %3482 = vtanh.f32 %v2519_v21 }
 0x6e6   :  { %3484 = vpow2.f32 %v3179_v22 }
 0x6ef   :  { %v3479_v23 = vpop.eup %3478 }
 0x6f0   :  { %v2524_v42 = vadd.f32 1.0, %v3479_v23 }
 0x6f1   :  { %v3481_v1 = vpop.eup %3480 }
 0x6f2   :  { %3486 = vrcp.f32 %v2524_v42  ;;  %v2530_v29 = vadd.f32 1.0, %v3481_v1  ;;  %v3483_v31 = vpop.eup %3482 }
 0x6f3   :  { %v3485_v32 = vpop.eup %3484 }
 0x6f4   :  { %3488 = vrcp.f32 %v2530_v29  ;;  %v2537_v35 = vadd.f32 1.0, %v3485_v32 }
 0x6f6   :  { %3490 = vrcp.f32 %v2537_v35 }
 0x6ff   :  { %v3487_v33 = vpop.eup %3486 }
 0x700   :  { %v2541_v3 = vmul.f32 %v3487_v33, %v3483_v31 }
 0x701   :  { %v3489_v2 = vpop.eup %3488 }
 0x702   :  { %v2540_v37 = vmul.f32 %v3489_v2, %v4213_v28 }
 0x703   :  { %v3491_v40 = vpop.eup %3490 }
 0x704   :  { %v2542_v38 = vadd.f32 %v2541_v3, %v2540_v37 }
 0x706   :  { %3492 = vtanh.f32 %v2542_v38  ;;  %v2554_v39 = vsel %vm2552_vm0, %v2542_v38, %v4213_v28 }
 0x713   :  { %v3493_v41 = vpop.eup %3492 }
 0x714   :  { %v2544_v25 = vmul.f32 %v3493_v41, %v3491_v40 }
 0x716   :  { %v2553_v5 = vsel %vm2552_vm0, %v2544_v25, %v4216_v48  ;;  %v2555_v44 = vsel %vm2552_vm0, %v2544_v25, 0.0 }
 0x717   :  { %v2556_v26 = vpack.c.bf16 %v2555_v44, %v2555_v44  ;;  %v2563_v57 = vpack.c.bf16 %v2553_v5, %v2553_v5 }
 0x719   :  { %2558 = vst [vmem:[#allocation7 + $0x18] sm:$0xf] %v2556_v26  ;;  %2789 = vmatmul.mubr.bf16.vlgmr.msra.gmra.mxu0 %v2563_v57  ;;  %2830 = vmatmul.mubr.bf16.vlgmr.msra.gmra.mxu1 %v2563_v57 }
 0x7d9   :  { %v2790_v7 = vpop.f32.mrf.mxu0  ;;  %v2831_v63 = vpop.f32.mrf.mxu1 }
 0x7da   :  { %v2838_v4 = vadd.f32 %v2790_v7, %v4283_v30  ;;  %v2840_v46 = vadd.f32 %v2831_v63, %v4284_v61 }
 0x7db   :  { %v2792_v47 = vpop.f32.mrf.mxu0  ;;  %v2833_v49 = vpop.f32.mrf.mxu1 }
 0x7dc   :  { %v3213_v24 = vmul.f32 -1.442695, %v2838_v4  ;;  %v2839_v28 = vadd.f32 %v2792_v47, %v3899_v9  ;;  %v2841_v52 = vadd.f32 %v2833_v49, %v3902_v14 }
 0x7dd   :  { %v2794_v45 = vpop.f32.mrf.mxu0  ;;  %v2835_v34 = vpop.f32.mrf.mxu1 }
 0x7de   :  { %3494 = vpow2.f32 %v3213_v24  ;;  %v3214_v27 = vmul.f32 -1.442695, %v2839_v28  ;;  %v3215_v58 = vmul.f32 -1.442695, %v2841_v52 }
 0x7df   :  { %v2795_v48 = vpop.f32.mrf.mxu0  ;;  %v2836_v43 = vpop.f32.mrf.mxu1 }
 0x7e0   :  { %3496 = vpow2.f32 %v3214_v27 }
 0x7e1   :  { %3498 = vtanh.f32 %v2840_v46 }
 0x7e2   :  { %3500 = vpow2.f32 %v3215_v58 }
 0x7eb   :  { %v3495_v60 = vpop.eup %3494 }
 0x7ec   :  { %v2845_v56 = vadd.f32 1.0, %v3495_v60 }
 0x7ed   :  { %v3497_v54 = vpop.eup %3496 }
 0x7ee   :  { %3502 = vrcp.f32 %v2845_v56  ;;  %v2851_v55 = vadd.f32 1.0, %v3497_v54  ;;  %v3499_v9 = vpop.eup %3498 }
 0x7ef   :  { %v3501_v50 = vpop.eup %3500 }
 0x7f0   :  { %3504 = vrcp.f32 %v2851_v55  ;;  %v2858_v59 = vadd.f32 1.0, %v3501_v50 }
 0x7f2   :  { %3506 = vrcp.f32 %v2858_v59 }
 0x7fb   :  { %v3503_v51 = vpop.eup %3502 }
 0x7fc   :  { %v2862_v0 = vmul.f32 %v3503_v51, %v3499_v9 }
 0x7fd   :  { %v3505_v53 = vpop.eup %3504 }
 0x7fe   :  { %v2861_v62 = vmul.f32 %v3505_v53, %v2554_v39 }
 0x7ff   :  { %v3507_v14 = vpop.eup %3506 }
 0x800   :  { %v2863_v6 = vadd.f32 %v2862_v0, %v2861_v62 }
 0x802   :  { %3508 = vtanh.f32 %v2863_v6 }
 0x80f   :  { %v3509_v10 = vpop.eup %3508 }
 0x810   :  { %v2865_v11 = vmul.f32 %v3509_v10, %v3507_v14 }
 0x812   :  { %v2876_v12 = vsel %vm2873_vm1, %v2865_v11, 0.0  ;;  %v2874_v13 = vsel %vm2873_vm1, %v2865_v11, %v2553_v5 }
 0x813   :  { %v2877_v15 = vpack.c.bf16 %v2876_v12, %v2876_v12  ;;  %2880 = vst [vmem:[#allocation8] sm:$0xff] %v2874_v13 }
 0x814   :  { %3547 = shalt.err (!%p3544_p9)
}
 0x815   :  { %2903 = dma.vmem_to_hbm [thread:$0]  %s2901_s20, 128, %s4245_s6, [#allocation9]   ;;  %2879 = vst [vmem:[#allocation7 + $0x1c] sm:$0xf] %v2877_v15 }
 0x816   :  { %s3556_s26 = scalar_lea.vmem %s2888_s22, 512  ;;  %p3561_p11 = scmp.lt.s32.totalorder %s2888_s22, %s2888_s22 }
 0x817   :  { %p3557_p10 = scmp.ne.s32.totalorder %s2888_s22, %s3556_s26  ;;  %p3562_p12 = scmp.lt.s32.totalorder %s3556_s26, %s3556_s26 }
 0x819   :  { %p3563_p13 = por %p3562_p12, %p3561_p11 }
 0x81b   :  { %p3564_p0 = pnand %p3563_p13, %p3557_p10 }
 0x81d   :  { %3567 = shalt.err (!%p3564_p0)
}
 0x81e   :  { %s3589_s27 = smov 64   ;;  %s3590_s28 = smov 4  }
 0x81f   :  { %2893 = dma.vmem_to_hbm [thread:$0]  %s2888_s22, 512, %s4244_s5, [#allocation6], %s3589_s27, %s3589_s27, %s3590_s28  }
 0x820   :  { %3578 = dma.done.wait [#allocation6], 512  }
 0x821   :  { %3579 = vsyncadd [#allocation6], 4294966784 }
 0x822   :  { %3580 = dma.done.wait [#allocation9], 128  }
 0x823   :  { %3581 = vsyncadd [#allocation9], 4294967168 }
 0x824   :  { %2910 = vsyncpa [#allocation5], 1 }
 0x825   :  { %2911 = vsyncpa [#allocation6], 1 }
 0x826   :  { %2912 = vsyncpa [#allocation9], 1 }

</bundles_post_ra>
